<compile_context>
chip_gen: v7x
topology: tpu7x:2x2x1
jax: 0.10.0
libtpu: 0.0.40
codegen_flags: <defaults>
</compile_context>

<pallas_src>
import numpy as np
import jax
import jax.numpy as jnp
from jax.experimental import pallas as pl
from jax.experimental.pallas import tpu as pltpu


# ----------------------------- VMEM budget helper ---------------------------

_VMEM_LIMIT_CACHE = []


def _vmem_limit_bytes():
    """~3/4 of physical VMEM, capped at 96 MiB (v5e/v6e phys 128 MiB, v7x 64)."""
    if not _VMEM_LIMIT_CACHE:
        try:
            cap = pltpu.get_tpu_info().vmem_capacity_bytes
        except Exception:
            cap = 64 * 1024 * 1024
        _VMEM_LIMIT_CACHE.append(int(min(cap * 3 // 4, 96 * 1024 * 1024)))
    return _VMEM_LIMIT_CACHE[0]


def _mosaic_params(dims):
    return pltpu.CompilerParams(dimension_semantics=dims,
                                vmem_limit_bytes=_vmem_limit_bytes())


# --------------------- fused 1x1 Conv(+BN)+SiLU group matmul ----------------

def _make_mm_group_silu_kernel(n_in, out_segs):
    """o_k = silu(sum_i x_i @ w_i + b)[:, seg_k]: fused 1x1 Conv+BN+SiLU over a
    channel-concatenated input, with the output optionally split into channel
    segments (separate HBM arrays) so downstream kernels never over-read.
    Operands are already bf16; accumulation/epilogue in f32; bf16 store."""
    def kernel(*refs):
        x_refs = refs[:n_in]
        w_refs = refs[n_in:2 * n_in]
        b_ref = refs[2 * n_in]
        o_refs = refs[2 * n_in + 1:]
        acc = None
        for x_ref, w_ref in zip(x_refs, w_refs):
            p = jnp.dot(x_ref[...], w_ref[...], preferred_element_type=jnp.float32)
            acc = p if acc is None else acc + p
        acc = acc + b_ref[...]
        act = acc * jax.nn.sigmoid(acc)
        for o_ref, (off, sz) in zip(o_refs, out_segs):
            o_ref[...] = act[:, off:off + sz].astype(o_ref.dtype)
    return kernel


def mm_group_bias_silu(x_list, w_list, bias, out_splits=None, block_rows=1024,
                       out_dtype=jnp.bfloat16):
    """silu(concat(x_list, -1) @ concat_rows(w_list) + bias), row-tiled.
    Ragged row tails are handled by the cdiv grid (OOB writes dropped); no HBM
    pad copies. Returns a tuple when out_splits is given, else one array."""
    n_in = len(x_list)
    R = x_list[0].shape[0]
    M = w_list[0].shape[1]
    splits = list(out_splits) if out_splits is not None else [M]
    assert sum(splits) == M
    offs, o = [], 0
    for s in splits:
        offs.append(o)
        o += s

    br = R if R <= block_rows else block_rows          # full dim or multiple of 8
    grid = (pl.cdiv(R, br),)

    in_specs = [pl.BlockSpec((br, x.shape[1]), lambda i: (i, 0)) for x in x_list]
    in_specs += [pl.BlockSpec(w.shape, lambda i: (0, 0)) for w in w_list]
    in_specs += [pl.BlockSpec((1, M), lambda i: (0, 0))]
    out_shape = tuple(jax.ShapeDtypeStruct((R, s), out_dtype) for s in splits)
    out_specs = tuple(pl.BlockSpec((br, s), lambda i: (i, 0)) for s in splits)

    outs = pl.pallas_call(
        _make_mm_group_silu_kernel(n_in, list(zip(offs, splits))),
        out_shape=out_shape,
        grid=grid,
        in_specs=in_specs,
        out_specs=out_specs,
        compiler_params=_mosaic_params(("parallel",)),
    )(*x_list, *w_list, bias.reshape(1, M).astype(jnp.float32))
    return outs if out_splits is not None else outs[0]


# ------------------------- 3x3 Conv(+BN)+SiLU kernel -------------------------

def _make_conv3x3_silu_kernel(H, W):
    """'same' 3x3 Conv+BN+SiLU over a whole (H*W, Cin) bf16 image as 9 shifted
    matmuls. Shifts are zero-padded row slides (no wrap), boundary validity is
    a precomputed (HW,1) bf16 mask multiply, accumulation in f32 on the MXU."""
    HW = H * W

    def kernel(x_ref, w_ref, b_ref, o_ref):
        x = x_ref[...]                                             # (HW, cin) bf16
        cin = x.shape[1]
        cout = o_ref.shape[1]
        pix = jax.lax.broadcasted_iota(jnp.int32, (HW, 1), 0)
        py = pix // W
        px = pix % W
        acc = jnp.zeros((HW, cout), jnp.float32)
        for dy in (-1, 0, 1):
            row_ok = (py + dy >= 0) & (py + dy < H)
            for dx in (-1, 0, 1):
                col_ok = (px + dx >= 0) & (px + dx < W)
                mask = (row_ok & col_ok).astype(x.dtype)           # (HW, 1) bf16
                shift = dy * W + dx                                # tap row = p + shift
                if shift == 0:
                    shifted = x
                elif shift > 0:
                    shifted = jnp.concatenate(
                        [x[shift:], jnp.zeros((shift, cin), x.dtype)], axis=0)
                else:
                    shifted = jnp.concatenate(
                        [jnp.zeros((-shift, cin), x.dtype), x[:HW + shift]], axis=0)
                tap = shifted * mask
                w_tap = w_ref[(dy + 1) * 3 + (dx + 1)]             # (cin, cout) bf16
                acc = acc + jnp.dot(tap, w_tap, preferred_element_type=jnp.float32)
        acc = acc + b_ref[...]
        o_ref[...] = (acc * jax.nn.sigmoid(acc)).astype(o_ref.dtype)
    return kernel


def conv3x3_bn_silu(x_rows, w9_bf16, bias, B, H, W):
    """x_rows: (B*H*W, cin) bf16 channels-last rows; w9_bf16: (9, cin, cout)."""
    HW = H * W
    assert HW % 8 == 0 or B == 1, "H*W must be a multiple of 8 when B > 1"
    cin = x_rows.shape[1]
    cout = w9_bf16.shape[2]
    return pl.pallas_call(
        _make_conv3x3_silu_kernel(H, W),
        out_shape=jax.ShapeDtypeStruct((B * HW, cout), jnp.bfloat16),
        grid=(B,),
        in_specs=[
            pl.BlockSpec((HW, cin), lambda b: (b, 0)),
            pl.BlockSpec((9, cin, cout), lambda b: (0, 0, 0)),
            pl.BlockSpec((1, cout), lambda b: (0, 0)),
        ],
        out_specs=pl.BlockSpec((HW, cout), lambda b: (b, 0)),
        compiler_params=_mosaic_params(("parallel",)),
    )(x_rows, w9_bf16, bias.reshape(1, cout).astype(jnp.float32))


# -------------------- ESSAttn: token-tiled two-pass + residual --------------
# Pass 1: per token tile, compute k2 (row-local stats) and v, accumulate
#   kv_acc += k2^T v and colsq += sum_n k2^2.  Finalize inv_s = 1/(sqrt(colsq)
#   clamped * sqrt(N)) so the k2 column normalization and 1/sqrt(N) are folded
#   into a (1, C) scale applied to q2 in pass 2 (mathematically identical).
# Pass 2: per token tile, compute q2 (row-local), t2 = (q2*inv_s) @ kv,
#   attn = v + t2, out = attn @ Wln + b, and store x + out (fused residual).

_ESS_TOKEN_TILE = 128  # sweep 128..1024 per chip; 128 keeps small maps tiled too


def _make_ess_kv_kernel(N, TN, C):
    inv_sqrt_n = 1.0 / float(N) ** 0.5
    ragged = (N % TN) != 0

    def kernel(x_ref, wkv_ref, bkv_ref, kv_ref, invs_ref, kv_acc, colsq_acc):
        j = pl.program_id(1)

        @pl.when(j == 0)
        def _():
            kv_acc[...] = jnp.zeros_like(kv_acc)
            colsq_acc[...] = jnp.zeros_like(colsq_acc)

        x = x_ref[0]                                               # (TN, C) bf16
        kvp = jnp.dot(x, wkv_ref[...],
                      preferred_element_type=jnp.float32) + bkv_ref[...]
        k = kvp[:, :C]
        v = kvp[:, C:]
        k = k - jnp.mean(k, axis=1, keepdims=True)
        k2 = k * k
        k2 = k2 / (jnp.sum(k2, axis=1, keepdims=True) + 1e-7)
        if ragged:
            tok = j * TN + jax.lax.broadcasted_iota(jnp.int32, (TN, 1), 0)
            valid = tok < N
            k2 = jnp.where(valid, k2, 0.0)
            v = jnp.where(valid, v, 0.0)
        colsq_acc[...] += jnp.sum(k2 * k2, axis=0, keepdims=True)
        kv_acc[...] += jax.lax.dot_general(
            k2.astype(jnp.bfloat16), v.astype(jnp.bfloat16),
            (((0,), (0,)), ((), ())), preferred_element_type=jnp.float32)

        @pl.when(j == pl.num_programs(1) - 1)
        def _():
            inv_s = inv_sqrt_n / jnp.maximum(jnp.sqrt(colsq_acc[...]), 1e-12)
            invs_ref[0] = inv_s
            kv_ref[0] = kv_acc[...].astype(jnp.bfloat16)
    return kernel


def _make_ess_out_kernel(C):
    def kernel(x_ref, wqv_ref, bqv_ref, kv_ref, invs_ref, wln_ref, bln_ref, o_ref):
        x = x_ref[0]                                               # (TN, C) bf16
        qv = jnp.dot(x, wqv_ref[...],
                     preferred_element_type=jnp.float32) + bqv_ref[...]
        q = qv[:, :C]
        v = qv[:, C:]
        q = q - jnp.mean(q, axis=1, keepdims=True)
        q2 = q * q
        q2 = q2 / (jnp.sum(q2, axis=1, keepdims=True) + 1e-7)
        q2 = q2 / jnp.maximum(jnp.sqrt(jnp.sum(q2 * q2, axis=1, keepdims=True)), 1e-12)
        q2 = q2 * invs_ref[0]            # folded k2-column-norm and 1/sqrt(N)
        t2 = jnp.dot(q2.astype(jnp.bfloat16), kv_ref[0],
                     preferred_element_type=jnp.float32)
        attn = v + t2
        out = jnp.dot(attn.astype(jnp.bfloat16), wln_ref[...],
                      preferred_element_type=jnp.float32) + bln_ref[...]
        o_ref[0] = x.astype(jnp.float32) + out                     # fused residual
    return kernel


def essattn_residual(x_seq, wqkv, bqkv, wln, bln, token_tile=_ESS_TOKEN_TILE):
    """x_seq: (B, N, C) bf16.  Returns (B, N, C) f32 = x + ESSAttn(x)."""
    B, N, C = x_seq.shape
    TN = N if N <= token_tile else token_tile
    assert TN == N or TN % 8 == 0
    nT = pl.cdiv(N, TN)

    wkv = wqkv[:, C:].astype(jnp.bfloat16)                          # [k | v]
    bkv = bqkv[C:].reshape(1, 2 * C).astype(jnp.float32)
    wqv = jnp.concatenate([wqkv[:, :C], wqkv[:, 2 * C:]], axis=1).astype(jnp.bfloat16)
    bqv = jnp.concatenate([bqkv[:C], bqkv[2 * C:]]).reshape(1, 2 * C).astype(jnp.float32)
    wln_b = wln.astype(jnp.bfloat16)
    bln_b = bln.reshape(1, C).astype(jnp.float32)

    kv, inv_s = pl.pallas_call(
        _make_ess_kv_kernel(N, TN, C),
        out_shape=(jax.ShapeDtypeStruct((B, C, C), jnp.bfloat16),
                   jax.ShapeDtypeStruct((B, 1, C), jnp.float32)),
        grid=(B, nT),
        in_specs=[
            pl.BlockSpec((1, TN, C), lambda b, j: (b, j, 0)),
            pl.BlockSpec((C, 2 * C), lambda b, j: (0, 0)),
            pl.BlockSpec((1, 2 * C), lambda b, j: (0, 0)),
        ],
        out_specs=(pl.BlockSpec((1, C, C), lambda b, j: (b, 0, 0)),
                   pl.BlockSpec((1, 1, C), lambda b, j: (b, 0, 0))),
        scratch_shapes=[pltpu.VMEM((C, C), jnp.float32),
                        pltpu.VMEM((1, C), jnp.float32)],
        compiler_params=_mosaic_params(("parallel", "arbitrary")),
    )(x_seq, wkv, bkv)

    out = pl.pallas_call(
        _make_ess_out_kernel(C),
        out_shape=jax.ShapeDtypeStruct((B, N, C), jnp.float32),
        grid=(B, nT),
        in_specs=[
            pl.BlockSpec((1, TN, C), lambda b, j: (b, j, 0)),
            pl.BlockSpec((C, 2 * C), lambda b, j: (0, 0)),
            pl.BlockSpec((1, 2 * C), lambda b, j: (0, 0)),
            pl.BlockSpec((1, C, C), lambda b, j: (b, 0, 0)),
            pl.BlockSpec((1, 1, C), lambda b, j: (b, 0, 0)),
            pl.BlockSpec((C, C), lambda b, j: (0, 0)),
            pl.BlockSpec((1, C), lambda b, j: (0, 0)),
        ],
        out_specs=pl.BlockSpec((1, TN, C), lambda b, j: (b, j, 0)),
        compiler_params=_mosaic_params(("parallel", "parallel")),
    )(x_seq, wqv, bqv, kv, inv_s, wln_b, bln_b)
    return out


# ----------------------- parameter setup (plain JAX glue) -------------------

def init_conv_bn(key, cin, cout, k):
    """Conv2d(bias=False) + BatchNorm2d folded into (HWIO weight, bias)."""
    kw, kg, kb, km, kv = jax.random.split(key, 5)
    w = jax.random.normal(kw, (k, k, cin, cout), jnp.float32) * 0.1        # HWIO
    gamma = 1.0 + 0.1 * jax.random.normal(kg, (cout,), jnp.float32)
    beta = 0.1 * jax.random.normal(kb, (cout,), jnp.float32)
    mean = 0.1 * jax.random.normal(km, (cout,), jnp.float32)
    var = 1.0 + 0.1 * jnp.abs(jax.random.normal(kv, (cout,), jnp.float32))
    scale = gamma / jnp.sqrt(var + 1e-5)
    return {'w4': w * scale, 'b': beta - mean * scale, 'k': k}


def init_linear(key, cin, cout):
    kw, kb = jax.random.split(key)
    w = jax.random.normal(kw, (cin, cout), jnp.float32) * 0.1
    b = jax.random.normal(kb, (cout,), jnp.float32) * 0.1
    return w, b


def init_params(key, c1, c2, n=1, e=0.5):
    c = int(c2 * e)
    keys = jax.random.split(key, 4 + 2 * n)
    params = {'c': c, 'n': n}
    params['cv1'] = init_conv_bn(keys[0], c1, 2 * c, 1)
    params['cv2'] = init_conv_bn(keys[1], (2 + n) * c, c2, 1)
    for i in range(n):
        params[f'm{i}_cv1'] = init_conv_bn(keys[2 + 2 * i], c, c, 3)
        params[f'm{i}_cv2'] = init_conv_bn(keys[3 + 2 * i], c, c, 3)
    wqkv, bqkv = init_linear(keys[2 + 2 * n], c2, 3 * c2)
    wln, bln = init_linear(keys[3 + 2 * n], c2, c2)
    params['att'] = {'wqkv': wqkv, 'bqkv': bqkv, 'wln': wln, 'bln': bln}
    return params


# ----------------------------- forward (Pallas) -----------------------------

def c2f_essattn_forward(x_nchw, params):
    B, c1, H, W = x_nchw.shape
    c = params['c']
    n = params['n']
    x_rows = jnp.transpose(x_nchw, (0, 2, 3, 1)).reshape(B * H * W, c1)
    x_rows = x_rows.astype(jnp.bfloat16)

    # cv1: 1x1 Conv+BN+SiLU, output emitted directly as its two channel chunks.
    w_cv1 = params['cv1']['w4'].reshape(c1, 2 * c).astype(jnp.bfloat16)
    y0, y1 = mm_group_bias_silu([x_rows], [w_cv1], params['cv1']['b'],
                                out_splits=[c, c])

    # Bottlenecks (shortcut=False): two 3x3 Conv+BN+SiLU each, bf16 activations.
    feats = [y0, y1]
    cur = y1
    for i in range(n):
        p1, p2 = params[f'm{i}_cv1'], params[f'm{i}_cv2']
        t = conv3x3_bn_silu(cur, p1['w4'].reshape(9, c, c).astype(jnp.bfloat16),
                            p1['b'], B, H, W)
        s = conv3x3_bn_silu(t, p2['w4'].reshape(9, c, c).astype(jnp.bfloat16),
                            p2['b'], B, H, W)
        feats.append(s)
        cur = s

    # cv2 fused over the channel-concatenation: sum of per-segment matmuls
    # against row-slices of the cv2 weight (no HBM concat).
    c2 = params['cv2']['w4'].shape[-1]
    w_cv2 = params['cv2']['w4'].reshape((2 + n) * c, c2)
    w_list = [w_cv2[off:off + c].astype(jnp.bfloat16)
              for off in range(0, (2 + n) * c, c)]
    out = mm_group_bias_silu(feats, w_list, params['cv2']['b'])       # (BHW, c2) bf16

    # ESSAttn (two-pass, token-tiled) with the residual fused into pass 2.
    final = essattn_residual(out.reshape(B, H * W, c2),
                             params['att']['wqkv'], params['att']['bqkv'],
                             params['att']['wln'], params['att']['bln'])
    return jnp.transpose(final.reshape(B, H, W, c2), (0, 3, 1, 2))     # NCHW f32


# -------------------------- pure-JAX reference check ------------------------
# Mirrors the kernels' numerics (bf16 MXU operands / activations, f32
# accumulation, and the folded k2-column-norm factorization) so the allclose
# check validates kernel logic rather than dtype policy.

def _ref_conv_bn_silu(x_nhwc_bf16, p):
    out = jax.lax.conv_general_dilated(
        x_nhwc_bf16, p['w4'].astype(jnp.bfloat16),
        window_strides=(1, 1), padding='SAME',
        dimension_numbers=('NHWC', 'HWIO', 'NHWC'),
        preferred_element_type=jnp.float32)
    out = out + p['b']
    out = out * jax.nn.sigmoid(out)
    return out.astype(jnp.bfloat16)


def _ref_essattn_residual(x_bf16, wqkv, bqkv, wln, bln):
    _, N, C = x_bf16.shape
    bf = jnp.bfloat16
    qkv = jnp.einsum('bnc,cd->bnd', x_bf16, wqkv.astype(bf),
                     preferred_element_type=jnp.float32) + bqkv
    q, k, v = qkv[..., :C], qkv[..., C:2 * C], qkv[..., 2 * C:]
    q = q - jnp.mean(q, axis=-1, keepdims=True)
    k = k - jnp.mean(k, axis=-1, keepdims=True)
    q2, k2 = q * q, k * k
    q2 = q2 / (jnp.sum(q2, -1, keepdims=True) + 1e-7)
    k2 = k2 / (jnp.sum(k2, -1, keepdims=True) + 1e-7)
    q2 = q2 / jnp.maximum(jnp.sqrt(jnp.sum(q2 * q2, -1, keepdims=True)), 1e-12)
    inv_s = (1.0 / float(N) ** 0.5) / jnp.maximum(
        jnp.sqrt(jnp.sum(k2 * k2, axis=-2, keepdims=True)), 1e-12)
    kv = jnp.einsum('bnc,bnd->bcd', k2.astype(bf), v.astype(bf),
                    preferred_element_type=jnp.float32).astype(bf)
    t2 = jnp.einsum('bnc,bcd->bnd', (q2 * inv_s).astype(bf), kv,
                    preferred_element_type=jnp.float32)
    attn = v + t2
    out = jnp.einsum('bnc,cd->bnd', attn.astype(bf), wln.astype(bf),
                     preferred_element_type=jnp.float32) + bln
    return x_bf16.astype(jnp.float32) + out


def ref_forward(x_nchw, params):
    B, _, H, W = x_nchw.shape
    c = params['c']
    x = jnp.transpose(x_nchw, (0, 2, 3, 1)).astype(jnp.bfloat16)
    y = _ref_conv_bn_silu(x, params['cv1'])
    ys = [y[..., :c], y[..., c:]]
    for i in range(params['n']):
        t = _ref_conv_bn_silu(ys[-1], params[f'm{i}_cv1'])
        ys.append(_ref_conv_bn_silu(t, params[f'm{i}_cv2']))
    out = _ref_conv_bn_silu(jnp.concatenate(ys, axis=-1), params['cv2'])
    c2 = out.shape[-1]
    final = _ref_essattn_residual(out.reshape(B, H * W, c2),
                                  params['att']['wqkv'], params['att']['bqkv'],
                                  params['att']['wln'], params['att']['bln'])
    return jnp.transpose(final.reshape(B, H, W, c2), (0, 3, 1, 2))


if __name__ == "__main__":
    key = jax.random.PRNGKey(0)
    kx, kp = jax.random.split(key)
    x = jax.random.normal(kx, (2, 4, 16, 16), jnp.float32)   # NCHW, c1=4
    params = init_params(kp, c1=4, c2=4, n=1, e=0.5)

    out = jax.block_until_ready(c2f_essattn_forward(x, params))
    ref = jax.block_until_ready(ref_forward(x, params))
    assert out.shape == (2, 4, 16, 16)
    np.testing.assert_allclose(np.asarray(out), np.asarray(ref), rtol=2e-2, atol=2e-2)
    print("KERNEL_OK")
</pallas_src>

<mosaic_0001>
module attributes {stable_mosaic.version = 11 : i64} {
  func.func @kernel(%arg0: i32, %arg1: memref<512x4xbf16, #tpu.memory_space<vmem>>, %arg2: memref<4x4xbf16, #tpu.memory_space<vmem>>, %arg3: memref<1x4xf32, #tpu.memory_space<vmem>>, %arg4: memref<512x2xbf16, #tpu.memory_space<vmem>>, %arg5: memref<512x2xbf16, #tpu.memory_space<vmem>>) attributes {dimension_semantics = [#tpu.dimension_semantics<parallel>], iteration_bounds = array<i64: 1>, scalar_prefetch = 0 : i64, scratch_operands = 0 : i64, tpu.core_type = #tpu.core_type<tc>, window_params = [{transform_indices = @transform_0, window_bounds = array<i64: 512, 4>}, {pipeline_mode = #tpu.pipeline_mode<synchronous>, transform_indices = @transform_1, window_bounds = array<i64: 4, 4>}, {pipeline_mode = #tpu.pipeline_mode<synchronous>, transform_indices = @transform_2, window_bounds = array<i64: 1, 4>}, {transform_indices = @transform_3, window_bounds = array<i64: 512, 2>}, {transform_indices = @transform_4, window_bounds = array<i64: 512, 2>}]} {
    %c0 = arith.constant 0 : index
    %c0_0 = arith.constant 0 : index
    %0 = vector.load %arg1[%c0, %c0_0] : memref<512x4xbf16, #tpu.memory_space<vmem>>, vector<512x4xbf16>
    %c0_1 = arith.constant 0 : index
    %c0_2 = arith.constant 0 : index
    %1 = vector.load %arg2[%c0_1, %c0_2] : memref<4x4xbf16, #tpu.memory_space<vmem>>, vector<4x4xbf16>
    %cst = arith.constant dense<0.000000e+00> : vector<512x4xf32>
    %2 = tpu.matmul %0, %1, %cst {dimension_numbers = #tpu.dot_dimension_numbers<[1], [0], [0], [1], [0, 0, 1, 1], [], []>} : vector<512x4xbf16>, vector<4x4xbf16>, vector<512x4xf32> -> vector<512x4xf32>
    %c0_3 = arith.constant 0 : index
    %c0_4 = arith.constant 0 : index
    %3 = vector.load %arg3[%c0_3, %c0_4] : memref<1x4xf32, #tpu.memory_space<vmem>>, vector<1x4xf32>
    %4 = vector.broadcast %3 : vector<1x4xf32> to vector<512x4xf32>
    %5 = arith.addf %2, %4 : vector<512x4xf32>
    %6 = arith.negf %5 : vector<512x4xf32>
    %7 = math.exp %6 : vector<512x4xf32>
    %cst_5 = arith.constant 1.000000e+00 : f32
    %8 = vector.broadcast %cst_5 : f32 to vector<512x4xf32>
    %9 = arith.addf %8, %7 : vector<512x4xf32>
    %10 = arith.divf %8, %9 : vector<512x4xf32>
    %11 = arith.mulf %5, %10 : vector<512x4xf32>
    %12 = vector.extract_strided_slice %11 {offsets = [0, 0], sizes = [512, 2], strides = [1, 1]} : vector<512x4xf32> to vector<512x2xf32>
    %13 = arith.truncf %12 : vector<512x2xf32> to vector<512x2xbf16>
    %c0_6 = arith.constant 0 : index
    %c0_7 = arith.constant 0 : index
    %14 = vector.load %arg4[%c0_6, %c0_7] : memref<512x2xbf16, #tpu.memory_space<vmem>>, vector<512x2xbf16>
    tpu.vector_store %arg4[%c0_6, %c0_7], %13 {strides = array<i32>} : memref<512x2xbf16, #tpu.memory_space<vmem>>, vector<512x2xbf16>,
    %15 = vector.extract_strided_slice %11 {offsets = [0, 2], sizes = [512, 2], strides = [1, 1]} : vector<512x4xf32> to vector<512x2xf32>
    %16 = arith.truncf %15 : vector<512x2xf32> to vector<512x2xbf16>
    %c0_8 = arith.constant 0 : index
    %c0_9 = arith.constant 0 : index
    %17 = vector.load %arg5[%c0_8, %c0_9] : memref<512x2xbf16, #tpu.memory_space<vmem>>, vector<512x2xbf16>
    tpu.vector_store %arg5[%c0_8, %c0_9], %16 {strides = array<i32>} : memref<512x2xbf16, #tpu.memory_space<vmem>>, vector<512x2xbf16>,
    return
  }
  func.func @transform_0(%arg0: i32) -> (i32, i32) {
    %c0_i32 = arith.constant 0 : i32
    %c0_i32_0 = arith.constant 0 : i32
    return %arg0, %c0_i32 : i32, i32
  }
  func.func @transform_1(%arg0: i32) -> (i32, i32) {
    %c0_i32 = arith.constant 0 : i32
    %c0_i32_0 = arith.constant 0 : i32
    %c0_i32_1 = arith.constant 0 : i32
    return %c0_i32, %c0_i32_0 : i32, i32
  }
  func.func @transform_2(%arg0: i32) -> (i32, i32) {
    %c0_i32 = arith.constant 0 : i32
    %c0_i32_0 = arith.constant 0 : i32
    %c0_i32_1 = arith.constant 0 : i32
    return %c0_i32, %c0_i32_0 : i32, i32
  }
  func.func @transform_3(%arg0: i32) -> (i32, i32) {
    %c0_i32 = arith.constant 0 : i32
    %c0_i32_0 = arith.constant 0 : i32
    return %arg0, %c0_i32 : i32, i32
  }
  func.func @transform_4(%arg0: i32) -> (i32, i32) {
    %c0_i32 = arith.constant 0 : i32
    %c0_i32_0 = arith.constant 0 : i32
    return %arg0, %c0_i32 : i32, i32
  }
}

</mosaic_0001>

<bundles_post_ra>
// kernel: tpu_custom_call.1
= control target key start
LH: loop header
LB: loop body
LE: loop exit
PB: predicated region body
PF: predicated region fallthrough
CT: control target
= control target key end

     0   :  { %vm346_vm0 = vcmask 1041408   ;;  %vm249_vm1 = vcmask 31744   ;;  %vm1343_vm2 = vcmask 11264   ;;  %s2322_s29 = smov 126   ;;  %s3598_s1 = inlined_call_operand.vmem [shape: bf16[4,4], index: 1, kind: input, shape index: {}]   ;;  %s3599_s0 = inlined_call_operand.vmem [shape: bf16[512,4], index: 0, kind: input, shape index: {}]   ;;  %s3600_s2 = inlined_call_operand.vmem [shape: f32[1,4], index: 2, kind: input, shape index: {}]   ;;  %s3601_s3 = inlined_call_operand.vmem [shape: bf16[512,2], index: 3, kind: output, shape index: {0}]   ;;  %s3602_s4 = inlined_call_operand.vmem [shape: bf16[512,2], index: 4, kind: output, shape index: {1}]  }
   0x1   :  { %v81_v0 = vld [vmem:[%s3598_s1] sm:$0x3]  ;;  %v2035_v4 = vld [vmem:[%s3599_s0 + $0x8] sm:$0xff]   ;;  %v2037_v6 = vld [vmem:[%s3599_s0 + $0x10] sm:$0xff]  }
   0x2   :  { %2030 = vmatprep.subr.msk.bf16.mxu0 %vm346_vm0, %v81_v0  ;;  %2031 = vmatprep.subr.msk.bf16.mxu1 %vm346_vm0, %v81_v0  ;;  %v348_v1 = vsel %vm346_vm0, %v81_v0, 0  ;;  %v2033_v2 = vld [vmem:[%s3599_s0] sm:$0xff]   ;;  %v2036_v5 = vld [vmem:[%s3599_s0 + $0x88] sm:$0xff]   ;;  %v2038_v7 = vld [vmem:[%s3599_s0 + $0x90] sm:$0xff]  }
   0x3   :  { %1963 = vmatpush3.bf16.msra.mxu0 %v348_v1  ;;  %2029 = vmatpush3.bf16.msra.mxu1 %v348_v1  ;;  %v2034_v3 = vld [vmem:[%s3599_s0 + $0x80] sm:$0xff]   ;;  %v2039_v8 = vld [vmem:[%s3599_s0 + $0x18] sm:$0xff]   ;;  %v2043_v12 = vld [vmem:[%s3599_s0 + $0x28] sm:$0xff]  }
   0x4   :  { %1964 = vmatprep.mubr.msk.bf16.mxu0 %vm249_vm1, %v2033_v2  ;;  %1996 = vmatprep.mubr.msk.bf16.mxu1 %vm249_vm1, %v2034_v3  ;;  %v2040_v9 = vld [vmem:[%s3599_s0 + $0x98] sm:$0xff]   ;;  %v2041_v10 = vld [vmem:[%s3599_s0 + $0x20] sm:$0xff]   ;;  %v2044_v13 = vld [vmem:[%s3599_s0 + $0xa8] sm:$0xff]  }
   0x5   :  { %v2042_v11 = vld [vmem:[%s3599_s0 + $0xa0] sm:$0xff]   ;;  %v2045_v14 = vld [vmem:[%s3599_s0 + $0x30] sm:$0xff]   ;;  %v2047_v16 = vld [vmem:[%s3599_s0 + $0x38] sm:$0xff]  }
   0x6   :  { %1965 = vmatmul.mubr.msk.bf16.vlgmr.msra.gmra.mrb[0].mxu0 %vm249_vm1, %v2035_v4  ;;  %1997 = vmatmul.mubr.msk.bf16.vlgmr.msra.gmra.mrb[0].mxu1 %vm249_vm1, %v2036_v5  ;;  %v2046_v15 = vld [vmem:[%s3599_s0 + $0xb0] sm:$0xff]   ;;  %v2048_v17 = vld [vmem:[%s3599_s0 + $0xb8] sm:$0xff]   ;;  %v2049_v18 = vld [vmem:[%s3599_s0 + $0x40] sm:$0xff]  }
   0x7   :  { %1968 = vmatprep.mubr.msk.bf16.mxu0 %vm249_vm1, %v2037_v6  ;;  %2000 = vmatprep.mubr.msk.bf16.mxu1 %vm249_vm1, %v2038_v7  ;;  %v2051_v19 = vld [vmem:[%s3599_s0 + $0xc0] sm:$0xff]   ;;  %v2050_v20 = vld [vmem:[%s3599_s0 + $0x48] sm:$0xff]   ;;  %v2053_v22 = vld [vmem:[%s3599_s0 + $0x50] sm:$0xff]  }
   0x8   :  { %v2052_v21 = vld [vmem:[%s3599_s0 + $0xc8] sm:$0xff]   ;;  %v2055_v23 = vld [vmem:[%s3599_s0 + $0xd0] sm:$0xff]   ;;  %v2054_v24 = vld [vmem:[%s3599_s0 + $0x58] sm:$0xff]  }
   0x9   :  { %v2056_v25 = vld [vmem:[%s3599_s0 + $0xd8] sm:$0xff]   ;;  %v2057_v26 = vld [vmem:[%s3599_s0 + $0x60] sm:$0xff]   ;;  %v2058_v28 = vld [vmem:[%s3599_s0 + $0x68] sm:$0xff]  }
   0xa   :  { %v2059_v27 = vld [vmem:[%s3599_s0 + $0xe0] sm:$0xff]   ;;  %v2060_v29 = vld [vmem:[%s3599_s0 + $0xe8] sm:$0xff]   ;;  %v2061_v30 = vld [vmem:[%s3599_s0 + $0x70] sm:$0xff]  }
   0xb   :  { %v2063_v31 = vld [vmem:[%s3599_s0 + $0xf0] sm:$0xff]   ;;  %v2062_v32 = vld [vmem:[%s3599_s0 + $0x78] sm:$0xff]   ;;  %v2482_v34 = vld [vmem:[%s3600_s2] ss:$0 sm:$0xff] }
   0xc   :  { %v2064_v33 = vld [vmem:[%s3599_s0 + $0xf8] sm:$0xff]  }
   0xe   :  { %1969 = vmatmul.mubr.msk.bf16.gmra.mrb[4].mxu0 %vm249_vm1, %v2039_v8  ;;  %2001 = vmatmul.mubr.msk.bf16.gmra.mrb[4].mxu1 %vm249_vm1, %v2040_v9 }
   0xf   :  { %1972 = vmatprep.mubr.msk.bf16.mxu0 %vm249_vm1, %v2041_v10  ;;  %2004 = vmatprep.mubr.msk.bf16.mxu1 %vm249_vm1, %v2042_v11 }
  0x16   :  { %1973 = vmatmul.mubr.msk.bf16.gmra.mrb[8].mxu0 %vm249_vm1, %v2043_v12  ;;  %2005 = vmatmul.mubr.msk.bf16.gmra.mrb[8].mxu1 %vm249_vm1, %v2044_v13 }
  0x17   :  { %1976 = vmatprep.mubr.msk.bf16.mxu0 %vm249_vm1, %v2045_v14  ;;  %2008 = vmatprep.mubr.msk.bf16.mxu1 %vm249_vm1, %v2046_v15 }
  0x1e   :  { %1977 = vmatmul.mubr.msk.bf16.gmra.mrb[12].mxu0 %vm249_vm1, %v2047_v16  ;;  %2009 = vmatmul.mubr.msk.bf16.gmra.mrb[12].mxu1 %vm249_vm1, %v2048_v17 }
  0x1f   :  { %1980 = vmatprep.mubr.msk.bf16.mxu0 %vm249_vm1, %v2049_v18  ;;  %2012 = vmatprep.mubr.msk.bf16.mxu1 %vm249_vm1, %v2051_v19 }
  0x26   :  { %1981 = vmatmul.mubr.msk.bf16.gmra.mrb[16].mxu0 %vm249_vm1, %v2050_v20  ;;  %2013 = vmatmul.mubr.msk.bf16.gmra.mrb[16].mxu1 %vm249_vm1, %v2052_v21 }
  0x27   :  { %1984 = vmatprep.mubr.msk.bf16.mxu0 %vm249_vm1, %v2053_v22  ;;  %2016 = vmatprep.mubr.msk.bf16.mxu1 %vm249_vm1, %v2055_v23 }
  0x2e   :  { %1985 = vmatmul.mubr.msk.bf16.gmra.mrb[20].mxu0 %vm249_vm1, %v2054_v24  ;;  %2017 = vmatmul.mubr.msk.bf16.gmra.mrb[20].mxu1 %vm249_vm1, %v2056_v25 }
  0x2f   :  { %1988 = vmatprep.mubr.msk.bf16.mxu0 %vm249_vm1, %v2057_v26  ;;  %2020 = vmatprep.mubr.msk.bf16.mxu1 %vm249_vm1, %v2059_v27 }
  0x36   :  { %1989 = vmatmul.mubr.msk.bf16.gmra.mrb[24].mxu0 %vm249_vm1, %v2058_v28  ;;  %2021 = vmatmul.mubr.msk.bf16.gmra.mrb[24].mxu1 %vm249_vm1, %v2060_v29 }
  0x37   :  { %1992 = vmatprep.mubr.msk.bf16.mxu0 %vm249_vm1, %v2061_v30  ;;  %2024 = vmatprep.mubr.msk.bf16.mxu1 %vm249_vm1, %v2063_v31 }
  0x3e   :  { %1993 = vmatmul.mubr.msk.bf16.gmra.mrb[28].mxu0 %vm249_vm1, %v2062_v32  ;;  %2025 = vmatmul.mubr.msk.bf16.gmra.mrb[28].mxu1 %vm249_vm1, %v2064_v33 }
  0xd9   :  { %v1966_v35 = vpop.f32.mrb[0].mxu0  ;;  %v1998_v37 = vpop.f32.mrb[0].mxu1 }
  0xda   :  { %v2485_v36 = vadd.f32 %v1966_v35, %v2482_v34  ;;  %v384_v38 = vpop.f32.mrb[1].mxu0  ;;  %v2488_v39 = vadd.f32 %v1998_v37, %v2482_v34  ;;  %v512_v41 = vpop.f32.mrb[1].mxu1 }
  0xdb   :  { %v2491_v40 = vadd.f32 %v2482_v34, %v384_v38  ;;  %v1967_v42 = vpop.f32.mrb[2].mxu0  ;;  %v2495_v44 = vadd.f32 %v2482_v34, %v512_v41  ;;  %v1999_v46 = vpop.f32.mrb[2].mxu1 }
  0xdc   :  { %v1739_v43 = vmul.f32 -1.442695, %v2485_v36  ;;  %v2498_v45 = vadd.f32 %v1967_v42, %v2482_v34  ;;  %v387_v47 = vpop.f32.mrb[3].mxu0  ;;  %v1771_v48 = vmul.f32 -1.442695, %v2488_v39  ;;  %v2503_v50 = vadd.f32 %v1999_v46, %v2482_v34  ;;  %v515_v52 = vpop.f32.mrb[3].mxu1 }
  0xdd   :  { %v1737_v49 = vmul.f32 -1.442695, %v2491_v40  ;;  %v2506_v51 = vadd.f32 %v2482_v34, %v387_v47  ;;  %v1769_v53 = vmul.f32 -1.442695, %v2495_v44  ;;  %v2511_v55 = vadd.f32 %v2482_v34, %v515_v52 }
  0xde   :  { %2065 = vpow2.f32 %v1739_v43  ;;  %v1740_v54 = vmul.f32 -1.442695, %v2498_v45  ;;  %v1772_v56 = vmul.f32 -1.442695, %v2503_v50 }
  0xdf   :  { %2067 = vpow2.f32 %v1771_v48  ;;  %v1738_v57 = vmul.f32 -1.442695, %v2506_v51  ;;  %v1770_v58 = vmul.f32 -1.442695, %v2511_v55 }
  0xe0   :  { %2069 = vpow2.f32 %v1737_v49 }
  0xe1   :  { %2071 = vpow2.f32 %v1769_v53  ;;  %v1970_v59 = vpop.f32.mrb[4].mxu0  ;;  %v2002_v61 = vpop.f32.mrb[4].mxu1 }
  0xe2   :  { %2073 = vpow2.f32 %v1740_v54  ;;  %v2517_v60 = vadd.f32 %v1970_v59, %v2482_v34  ;;  %v400_v62 = vpop.f32.mrb[5].mxu0  ;;  %v2520_v63 = vadd.f32 %v2002_v61, %v2482_v34  ;;  %v528_v1 = vpop.f32.mrb[5].mxu1 }
  0xe3   :  { %2075 = vpow2.f32 %v1772_v56  ;;  %v2523_v0 = vadd.f32 %v2482_v34, %v400_v62  ;;  %v1971_v2 = vpop.f32.mrb[6].mxu0  ;;  %v2527_v4 = vadd.f32 %v2482_v34, %v528_v1  ;;  %v2003_v6 = vpop.f32.mrb[6].mxu1 }
  0xe4   :  { %2077 = vpow2.f32 %v1738_v57  ;;  %v1743_v3 = vmul.f32 -1.442695, %v2517_v60  ;;  %v2530_v5 = vadd.f32 %v1971_v2, %v2482_v34  ;;  %v403_v7 = vpop.f32.mrb[7].mxu0  ;;  %v1775_v8 = vmul.f32 -1.442695, %v2520_v63  ;;  %v531_v10 = vpop.f32.mrb[7].mxu1 }
  0xe5   :  { %2079 = vpow2.f32 %v1770_v58  ;;  %v1741_v9 = vmul.f32 -1.442695, %v2523_v0  ;;  %v1773_v11 = vmul.f32 -1.442695, %v2527_v4  ;;  %v2537_v27 = vadd.f32 %v2003_v6, %v2482_v34 }
  0xe6   :  { %2081 = vpow2.f32 %v1743_v3  ;;  %v1744_v12 = vmul.f32 -1.442695, %v2530_v5  ;;  %v2541_v46 = vadd.f32 %v2482_v34, %v403_v7  ;;  %v2544_v49 = vadd.f32 %v2482_v34, %v531_v10 }
  0xe7   :  { %2083 = vpow2.f32 %v1775_v8  ;;  %v1776_v43 = vmul.f32 -1.442695, %v2537_v27 }
  0xe8   :  { %v2066_v13 = vpop.eup %2065  ;;  %2085 = vpow2.f32 %v1741_v9  ;;  %v1742_v10 = vmul.f32 -1.442695, %v2541_v46 }
  0xe9   :  { %v2068_v14 = vpop.eup %2067  ;;  %v833_v15 = vadd.f32 1.0, %v2066_v13  ;;  %2087 = vpow2.f32 %v1773_v11  ;;  %v1974_v16 = vpop.f32.mrb[8].mxu0 }
  0xea   :  { %v2070_v17 = vpop.eup %2069  ;;  %v865_v18 = vadd.f32 1.0, %v2068_v14  ;;  %2089 = vpow2.f32 %v1744_v12  ;;  %v2006_v19 = vpop.f32.mrb[8].mxu1  ;;  %v2547_v52 = vadd.f32 %v1974_v16, %v2482_v34  ;;  %v1774_v16 = vmul.f32 -1.442695, %v2544_v49 }
  0xeb   :  { %v416_v20 = vpop.f32.mrb[9].mxu0  ;;  %v2072_v21 = vpop.eup %2071  ;;  %2091 = vrcp.f32 %v833_v15  ;;  %v831_v22 = vadd.f32 1.0, %v2070_v17  ;;  %v2550_v57 = vadd.f32 %v2006_v19, %v2482_v34 }
  0xec   :  { %v544_v23 = vpop.f32.mrb[9].mxu1  ;;  %v1975_v24 = vpop.f32.mrb[10].mxu0  ;;  %2093 = vrcp.f32 %v865_v18  ;;  %v863_v26 = vadd.f32 1.0, %v2072_v21  ;;  %v2553_v58 = vadd.f32 %v2482_v34, %v416_v20  ;;  %v1747_v20 = vmul.f32 -1.442695, %v2547_v52 }
  0xed   :  { %v2074_v25 = vpop.eup %2073  ;;  %v2007_v28 = vpop.f32.mrb[10].mxu1  ;;  %2095 = vrcp.f32 %v831_v22  ;;  %v2560_v2 = vadd.f32 %v2482_v34, %v544_v23  ;;  %v2563_v3 = vadd.f32 %v1975_v24, %v2482_v34  ;;  %v1779_v21 = vmul.f32 -1.442695, %v2550_v57 }
  0xee   :  { %v419_v29 = vpop.f32.mrb[11].mxu0  ;;  %v2076_v30 = vpop.eup %2075  ;;  %v834_v31 = vadd.f32 1.0, %v2074_v25  ;;  %2097 = vrcp.f32 %v863_v26  ;;  %v2571_v11 = vadd.f32 %v2007_v28, %v2482_v34  ;;  %v1745_v22 = vmul.f32 -1.442695, %v2553_v58 }
  0xef   :  { %v547_v32 = vpop.f32.mrb[11].mxu1  ;;  %v2078_v33 = vpop.eup %2077  ;;  %v866_v35 = vadd.f32 1.0, %v2076_v30  ;;  %v2579_v17 = vadd.f32 %v2482_v34, %v419_v29  ;;  %v1777_v24 = vmul.f32 -1.442695, %v2560_v2  ;;  %v1748_v25 = vmul.f32 -1.442695, %v2563_v3 }
  0xf0   :  { %v2080_v37 = vpop.eup %2079  ;;  %2099 = vrcp.f32 %v834_v31  ;;  %v832_v38 = vadd.f32 1.0, %v2078_v33  ;;  %v1780_v30 = vmul.f32 -1.442695, %v2571_v11  ;;  %v2592_v31 = vadd.f32 %v2482_v34, %v547_v32 }
  0xf1   :  { %v2082_v41 = vpop.eup %2081  ;;  %2101 = vrcp.f32 %v866_v35  ;;  %v864_v42 = vadd.f32 1.0, %v2080_v37  ;;  %v1978_v53 = vpop.f32.mrb[12].mxu0  ;;  %v1746_v37 = vmul.f32 -1.442695, %v2579_v17 }
  0xf2   :  { %v2084_v47 = vpop.eup %2083  ;;  %2103 = vrcp.f32 %v832_v38  ;;  %v837_v48 = vadd.f32 1.0, %v2082_v41  ;;  %v2555_v59 = vpop.f32.mrb[12].mxu1  ;;  %v2597_v38 = vadd.f32 %v1978_v53, %v2482_v34 }
  0xf3   :  { %v2086_v54 = vpop.eup %2085  ;;  %2105 = vrcp.f32 %v864_v42  ;;  %v869_v56 = vadd.f32 1.0, %v2084_v47  ;;  %v2557_v61 = vpop.f32.mrb[13].mxu0 }
  0xf4   :  { %v2088_v62 = vpop.eup %2087  ;;  %2107 = vrcp.f32 %v837_v48  ;;  %v835_v1 = vadd.f32 1.0, %v2086_v54  ;;  %v2565_v6 = vpop.f32.mrb[13].mxu1 }
  0xf5   :  { %v2567_v7 = vpop.f32.mrb[14].mxu0  ;;  %v2090_v8 = vpop.eup %2089  ;;  %2109 = vrcp.f32 %v869_v56  ;;  %v867_v9 = vadd.f32 1.0, %v2088_v62 }
  0xf6   :  { %v2573_v12 = vpop.f32.mrb[14].mxu1  ;;  %v2575_v13 = vpop.f32.mrb[15].mxu0  ;;  %2111 = vrcp.f32 %v835_v1  ;;  %v838_v15 = vadd.f32 1.0, %v2090_v8 }
  0xf7   :  { %v2092_v14 = vpop.eup %2091  ;;  %v2581_v18 = vpop.f32.mrb[15].mxu1  ;;  %2113 = vrcp.f32 %v867_v9 }
  0xf8   :  { %v2094_v19 = vpop.eup %2093  ;;  %2115 = vrcp.f32 %v838_v15  ;;  %v1025_v53 = vmul.f32 %v2092_v14, %v2485_v36 }
  0xf9   :  { %v2096_v23 = vpop.eup %2095  ;;  %v1057_v26 = vmul.f32 %v2094_v19, %v2488_v39  ;;  %2117 = vpow2.f32 %v1776_v43  ;;  %v2599_v41 = vpop.f32.mrb[16].mxu0 }
  0xfa   :  { %v2098_v28 = vpop.eup %2097  ;;  %v1023_v29 = vmul.f32 %v2096_v23, %v2491_v40  ;;  %2119 = vpow2.f32 %v1742_v10  ;;  %v2602_v47 = vpop.f32.mrb[17].mxu0  ;;  %v1867_v14 = vpack.c.bf16 %v1025_v53, %v1025_v53 }
  0xfb   :  { %v2100_v33 = vpop.eup %2099  ;;  %v1055_v35 = vmul.f32 %v2098_v28, %v2495_v44  ;;  %2121 = vpow2.f32 %v1774_v16  ;;  %v1899_v43 = vpack.c.bf16 %v1057_v26, %v1057_v26  ;;  %v2604_v32 = vpop.f32.mrb[16].mxu1  ;;  %v1751_v26 = vmul.f32 -1.442695, %v2597_v38 }
  0xfc   :  { %v2102_v39 = vpop.eup %2101  ;;  %v1865_v42 = vpack.c.bf16 %v1023_v29, %v1023_v29  ;;  %v1026_v40 = vmul.f32 %v2100_v33, %v2498_v45  ;;  %2123 = vpow2.f32 %v1747_v20  ;;  %v2610_v56 = vpop.f32.mrb[18].mxu0  ;;  %1412 = vrot.lane.b32.xlu1 %v1867_v14, %s2322_s29  ;;  %1346 = vst.msk [vmem:[%s3601_s3 + $0x8] sm:$0xf] %vm1343_vm2, %v1867_v14 }
  0xfd   :  { %v2104_v48 = vpop.eup %2103  ;;  %v2606_v44 = vpack.c.bf16 %v1055_v35, %v1055_v35  ;;  %v1058_v54 = vmul.f32 %v2102_v39, %v2503_v50  ;;  %v2612_v62 = vpop.f32.mrb[17].mxu1  ;;  %2125 = vpow2.f32 %v1779_v21  ;;  %v2621_v50 = vadd.f32 %v2555_v59, %v2482_v34  ;;  %1476 = vrot.lane.b32.xlu0 %v1899_v43, %s2322_s29  ;;  %1378 = vst.msk [vmem:[%s3601_s3 + $0x88] sm:$0xf] %vm1343_vm2, %v1899_v43 }
  0xfe   :  { %v2106_v1 = vpop.eup %2105  ;;  %1344 = vst.msk [vmem:[%s3601_s3] sm:$0xf] %vm1343_vm2, %v1865_v42  ;;  %v1868_v45 = vpack.c.bf16 %v1026_v40, %v1026_v40  ;;  %v1024_v8 = vmul.f32 %v2104_v48, %v2506_v51  ;;  %v2628_v36 = vpop.f32.mrb[19].mxu0  ;;  %2127 = vpow2.f32 %v1745_v22  ;;  %v1778_v21 = vmul.f32 -1.442695, %v2592_v31 }
  0xff   :  { %v2630_v9 = vpop.f32.mrb[18].mxu1  ;;  %v2108_v10 = vpop.eup %2107  ;;  %1376 = vst.msk [vmem:[%s3601_s3 + $0x80] sm:$0xf] %vm1343_vm2, %v2606_v44  ;;  %v2637_v51 = vpack.c.bf16 %v1058_v54, %v1058_v54  ;;  %v1056_v59 = vmul.f32 %v2106_v1, %v2511_v55  ;;  %2129 = vpow2.f32 %v1777_v24 }
 0x100   :  { %v2640_v15 = vpop.f32.mrb[19].mxu1  ;;  %v2110_v16 = vpop.eup %2109  ;;  %1347 = vst.msk [vmem:[%s3601_s3 + $0xc] sm:$0xf] %vm1343_vm2, %v1868_v45  ;;  %v2646_v19 = vpack.c.bf16 %v1024_v8, %v1024_v8  ;;  %v1029_v20 = vmul.f32 %v2108_v10, %v2517_v60  ;;  %2131 = vpow2.f32 %v1748_v25  ;;  %v1783_v25 = vmul.f32 -1.442695, %v2621_v50  ;;  %1414 = vrot.lane.b32.xlu1 %v1868_v45, %s2322_s29 }
 0x101   :  { %v2112_v23 = vpop.eup %2111  ;;  %1379 = vst.msk [vmem:[%s3601_s3 + $0x8c] sm:$0xf] %vm1343_vm2, %v2637_v51  ;;  %v2655_v55 = vpack.c.bf16 %v1056_v59, %v1056_v59  ;;  %v1061_v22 = vmul.f32 %v2110_v16, %v2520_v63  ;;  %2133 = vpow2.f32 %v1780_v30  ;;  %1408 = vrot.lane.b32.xlu0 %v1865_v42, %s2322_s29  ;;  %v2682_v35 = vpop.f32.mrb[20].mxu0 }
 0x102   :  { %v2114_v60 = vpop.eup %2113  ;;  %1345 = vst.msk [vmem:[%s3601_s3 + $0x4] sm:$0xf] %vm1343_vm2, %v2646_v19  ;;  %v2669_v24 = vpack.c.bf16 %v1029_v20, %v1029_v20  ;;  %v1027_v63 = vmul.f32 %v2112_v23, %v2523_v0  ;;  %2135 = vpow2.f32 %v1746_v37  ;;  %v2692_v42 = vpop.f32.mrb[21].mxu0  ;;  %v2735_v20 = vadd.f32 %v2482_v34, %v2557_v61 }
 0x103   :  { %v2116_v28 = vpop.eup %2115  ;;  %1377 = vst.msk [vmem:[%s3601_s3 + $0x84] sm:$0xf] %vm1343_vm2, %v2655_v55  ;;  %v2679_v29 = vpack.c.bf16 %v1061_v22, %v1061_v22  ;;  %v1059_v33 = vmul.f32 %v2114_v60, %v2527_v4  ;;  %2137 = vpow2.f32 %v1778_v21  ;;  %v2694_v40 = vpop.f32.mrb[20].mxu1 }
 0x104   :  { %v2118_v0 = vpop.eup %2117  ;;  %1350 = vst.msk [vmem:[%s3601_s3 + $0x18] sm:$0xf] %vm1343_vm2, %v2669_v24  ;;  %v2689_v30 = vpack.c.bf16 %v1027_v63, %v1027_v63  ;;  %v1030_v39 = vmul.f32 %v2116_v28, %v2530_v5  ;;  %2139 = vpow2.f32 %v1751_v26  ;;  %v2704_v48 = vpop.f32.mrb[22].mxu0  ;;  %1478 = vrot.lane.b32.xlu1 %v2637_v51, %s2322_s29 }
 0x105   :  { %v2120_v4 = vpop.eup %2119  ;;  %1382 = vst.msk [vmem:[%s3601_s3 + $0x98] sm:$0xf] %vm1343_vm2, %v2679_v29  ;;  %v2701_v37 = vpack.c.bf16 %v1059_v33, %v1059_v33  ;;  %v870_v43 = vadd.f32 1.0, %v2118_v0  ;;  %v2706_v5 = vpop.f32.mrb[21].mxu1  ;;  %2141 = vpow2.f32 %v1783_v25  ;;  %1472 = vrot.lane.b32.xlu0 %v2606_v44, %s2322_s29  ;;  %v1749_v33 = vmul.f32 -1.442695, %v2735_v20 }
 0x106   :  { %v2122_v54 = vpop.eup %2121  ;;  %1348 = vst.msk [vmem:[%s3601_s3 + $0x10] sm:$0xf] %vm1343_vm2, %v2689_v30  ;;  %v2713_v53 = vpack.c.bf16 %v1030_v39, %v1030_v39  ;;  %v836_v1 = vadd.f32 1.0, %v2120_v4  ;;  %v2717_v8 = vpop.f32.mrb[23].mxu0  ;;  %v2746_v0 = vadd.f32 %v2482_v34, %v2565_v6 }
 0x107   :  { %v2719_v45 = vpop.f32.mrb[22].mxu1  ;;  %v2124_v10 = vpop.eup %2123  ;;  %1380 = vst.msk [vmem:[%s3601_s3 + $0x90] sm:$0xf] %vm1343_vm2, %v2701_v37  ;;  %2143 = vrcp.f32 %v870_v43  ;;  %v868_v59 = vadd.f32 1.0, %v2122_v54  ;;  %v2754_v43 = vadd.f32 %v2567_v7, %v2482_v34  ;;  %v2758_v54 = vadd.f32 %v2573_v12, %v2482_v34 }
 0x108   :  { %v2726_v14 = vpop.f32.mrb[23].mxu1  ;;  %v2126_v16 = vpop.eup %2125  ;;  %1351 = vst.msk [vmem:[%s3601_s3 + $0x1c] sm:$0xf] %vm1343_vm2, %v2713_v53  ;;  %2145 = vrcp.f32 %v836_v1  ;;  %v841_v44 = vadd.f32 1.0, %v2124_v10  ;;  %1474 = vrot.lane.b32.xlu1 %v2655_v55, %s2322_s29  ;;  %v2772_v7 = vadd.f32 %v2482_v34, %v2581_v18 }
 0x109   :  { %v2128_v21 = vpop.eup %2127  ;;  %2147 = vrcp.f32 %v868_v59  ;;  %v873_v23 = vadd.f32 1.0, %v2126_v16  ;;  %1410 = vrot.lane.b32.xlu0 %v2646_v19, %s2322_s29  ;;  %v2741_v25 = vpop.f32.mrb[24].mxu0  ;;  %v2768_v16 = vadd.f32 %v2482_v34, %v2575_v13  ;;  %v2786_v13 = vadd.f32 %v2482_v34, %v2602_v47 }
 0x10a   :  { %v2130_v22 = vpop.eup %2129  ;;  %2149 = vrcp.f32 %v841_v44  ;;  %v839_v26 = vadd.f32 1.0, %v2128_v21  ;;  %v2748_v51 = vpop.f32.mrb[25].mxu0 }
 0x10b   :  { %v2132_v60 = vpop.eup %2131  ;;  %2151 = vrcp.f32 %v873_v23  ;;  %v871_v63 = vadd.f32 1.0, %v2130_v22  ;;  %v2750_v39 = vpop.f32.mrb[24].mxu1  ;;  %v2782_v23 = vadd.f32 %v2599_v41, %v2482_v34  ;;  %v1752_v41 = vmul.f32 -1.442695, %v2754_v43 }
 0x10c   :  { %v2134_v28 = vpop.eup %2133  ;;  %2153 = vrcp.f32 %v839_v26  ;;  %v842_v61 = vadd.f32 1.0, %v2132_v60  ;;  %v2762_v6 = vpop.f32.mrb[26].mxu0  ;;  %v1781_v26 = vmul.f32 -1.442695, %v2746_v0  ;;  %v2793_v60 = vadd.f32 %v2610_v56, %v2482_v34  ;;  %1422 = vrot.lane.b32.xlu1 %v2713_v53, %s2322_s29 }
 0x10d   :  { %v2136_v4 = vpop.eup %2135  ;;  %2155 = vrcp.f32 %v871_v63  ;;  %v874_v19 = vadd.f32 1.0, %v2134_v28  ;;  %v2764_v1 = vpop.f32.mrb[25].mxu1  ;;  %1420 = vrot.lane.b32.xlu0 %v2669_v24, %s2322_s29 }
 0x10e   :  { %v2138_v10 = vpop.eup %2137  ;;  %2157 = vrcp.f32 %v842_v61  ;;  %v840_v59 = vadd.f32 1.0, %v2136_v4  ;;  %v2776_v12 = vpop.f32.mrb[27].mxu0  ;;  %v1784_v61 = vmul.f32 -1.442695, %v2758_v54 }
 0x10f   :  { %v2778_v55 = vpop.f32.mrb[26].mxu1  ;;  %v2140_v44 = vpop.eup %2139  ;;  %2159 = vrcp.f32 %v874_v19  ;;  %v872_v21 = vadd.f32 1.0, %v2138_v10  ;;  %v1750_v19 = vmul.f32 -1.442695, %v2768_v16  ;;  %v1782_v10 = vmul.f32 -1.442695, %v2772_v7 }
 0x110   :  { %3603 = vst [vmem:[#allocation2_spill] sm:$0xff] %v2778_v55  ;;  %v2788_v18 = vpop.f32.mrb[27].mxu1  ;;  %v2142_v22 = vpop.eup %2141  ;;  %2161 = vrcp.f32 %v840_v59  ;;  %v845_v24 = vadd.f32 1.0, %v2140_v44  ;;  %v1755_v44 = vmul.f32 -1.442695, %v2782_v23 }
 0x111   :  { %3604 = vst [vmem:[#allocation3_spill] sm:$0xff] %v2788_v18  ;;  %v2144_v63 = vpop.eup %2143  ;;  %2163 = vrcp.f32 %v872_v21  ;;  %v877_v28 = vadd.f32 1.0, %v2142_v22  ;;  %1484 = vrot.lane.b32.xlu0 %v2679_v29, %s2322_s29  ;;  %v1753_v21 = vmul.f32 -1.442695, %v2786_v13  ;;  %v2807_v53 = vpop.f32.mrb[28].mxu0 }
 0x112   :  { %v2146_v47 = vpop.eup %2145  ;;  %v1062_v4 = vmul.f32 %v2144_v63, %v2537_v27  ;;  %2165 = vrcp.f32 %v845_v24  ;;  %3605 = vst [vmem:[#allocation4_spill] sm:$0xff] %v2807_v53  ;;  %v1756_v63 = vmul.f32 -1.442695, %v2793_v60  ;;  %v2811_v18 = vpop.f32.mrb[29].mxu0 }
 0x113   :  { %v2148_v56 = vpop.eup %2147  ;;  %v1028_v59 = vmul.f32 %v2146_v47, %v2541_v46  ;;  %2167 = vrcp.f32 %v877_v28  ;;  %v2813_v29 = vpop.f32.mrb[28].mxu1  ;;  %v2818_v47 = vadd.f32 %v2482_v34, %v2628_v36 }
 0x114   :  { %v2150_v22 = vpop.eup %2149  ;;  %v1904_v27 = vpack.c.bf16 %v1062_v4, %v1062_v4  ;;  %v1060_v24 = vmul.f32 %v2148_v56, %v2544_v49  ;;  %2169 = vpow2.f32 %v1749_v33  ;;  %v2820_v53 = vpop.f32.mrb[30].mxu0 }
 0x115   :  { %v2152_v55 = vpop.eup %2151  ;;  %v1870_v46 = vpack.c.bf16 %v1028_v59, %v1028_v59  ;;  %v1033_v28 = vmul.f32 %v2150_v22, %v2547_v52  ;;  %2171 = vpow2.f32 %v1781_v26  ;;  %v2822_v4 = vpop.f32.mrb[29].mxu1  ;;  %v2831_v52 = vadd.f32 %v2604_v32, %v2482_v34  ;;  %1416 = vrot.lane.b32.xlu0 %v2689_v30, %s2322_s29 }
 0x116   :  { %v2154_v49 = vpop.eup %2153  ;;  %1383 = vst.msk [vmem:[%s3601_s3 + $0x9c] sm:$0xf] %vm1343_vm2, %v1904_v27  ;;  %v1902_v33 = vpack.c.bf16 %v1060_v24, %v1060_v24  ;;  %v1065_v56 = vmul.f32 %v2152_v55, %v2550_v57  ;;  %2173 = vpow2.f32 %v1752_v41  ;;  %1486 = vrot.lane.b32.xlu1 %v1904_v27, %s2322_s29  ;;  %v2836_v36 = vpop.f32.mrb[31].mxu0  ;;  %v2847_v32 = vadd.f32 %v2482_v34, %v2612_v62 }
 0x117   :  { %v2838_v26 = vpop.f32.mrb[30].mxu1  ;;  %v2156_v59 = vpop.eup %2155  ;;  %1349 = vst.msk [vmem:[%s3601_s3 + $0x14] sm:$0xf] %vm1343_vm2, %v1870_v46  ;;  %v1875_v57 = vpack.c.bf16 %v1033_v28, %v1033_v28  ;;  %v1031_v55 = vmul.f32 %v2154_v49, %v2553_v58  ;;  %2175 = vpow2.f32 %v1784_v61  ;;  %v2858_v58 = vadd.f32 %v2630_v9, %v2482_v34 }
 0x118   :  { %v2849_v41 = vpop.f32.mrb[31].mxu1  ;;  %v2158_v30 = vpop.eup %2157  ;;  %1381 = vst.msk [vmem:[%s3601_s3 + $0x94] sm:$0xf] %vm1343_vm2, %v1902_v33  ;;  %v1907_v22 = vpack.c.bf16 %v1065_v56, %v1065_v56  ;;  %v1063_v27 = vmul.f32 %v2156_v59, %v2560_v2  ;;  %2177 = vpow2.f32 %v1750_v19  ;;  %v1754_v28 = vmul.f32 -1.442695, %v2818_v47 }
 0x119   :  { %v2160_v61 = vpop.eup %2159  ;;  %1354 = vst.msk [vmem:[%s3601_s3 + $0x28] sm:$0xf] %vm1343_vm2, %v1875_v57  ;;  %v2864_v62 = vpack.c.bf16 %v1031_v55, %v1031_v55  ;;  %v1034_v24 = vmul.f32 %v2158_v30, %v2563_v3  ;;  %2179 = vpow2.f32 %v1782_v10  ;;  %v1787_v19 = vmul.f32 -1.442695, %v2831_v52  ;;  %1480 = vrot.lane.b32.xlu0 %v2701_v37, %s2322_s29 }
 0x11a   :  { %v2162_v49 = vpop.eup %2161  ;;  %1386 = vst.msk [vmem:[%s3601_s3 + $0xa8] sm:$0xf] %vm1343_vm2, %v1907_v22  ;;  %v2872_v2 = vpack.c.bf16 %v1063_v27, %v1063_v27  ;;  %v1066_v9 = vmul.f32 %v2160_v61, %v2571_v11  ;;  %2181 = vpow2.f32 %v1755_v44  ;;  %1418 = vrot.lane.b32.xlu1 %v1870_v46, %s2322_s29  ;;  %v1785_v11 = vmul.f32 -1.442695, %v2847_v32 }
 0x11b   :  { %v2164_v3 = vpop.eup %2163  ;;  %1352 = vst.msk [vmem:[%s3601_s3 + $0x20] sm:$0xf] %vm1343_vm2, %v2864_v62  ;;  %v1876_v10 = vpack.c.bf16 %v1034_v24, %v1034_v24  ;;  %v1032_v56 = vmul.f32 %v2162_v49, %v2579_v17  ;;  %2183 = vpow2.f32 %v1753_v21  ;;  %v1788_v59 = vmul.f32 -1.442695, %v2858_v58 }
 0x11c   :  { %v2166_v44 = vpop.eup %2165  ;;  %1384 = vst.msk [vmem:[%s3601_s3 + $0xa0] sm:$0xf] %vm1343_vm2, %v2872_v2  ;;  %v1908_v37 = vpack.c.bf16 %v1066_v9, %v1066_v9  ;;  %v1064_v46 = vmul.f32 %v2164_v3, %v2592_v31  ;;  %2185 = vpow2.f32 %v1756_v63 }
 0x11d   :  { %v2168_v55 = vpop.eup %2167  ;;  %1355 = vst.msk [vmem:[%s3601_s3 + $0x2c] sm:$0xf] %vm1343_vm2, %v1876_v10  ;;  %v2897_v17 = vpack.c.bf16 %v1032_v56, %v1032_v56  ;;  %v1037_v21 = vmul.f32 %v2166_v44, %v2597_v38  ;;  %2187 = vpow2.f32 %v1754_v28  ;;  %1428 = vrot.lane.b32.xlu0 %v1875_v57, %s2322_s29  ;;  %v2937_v56 = vadd.f32 %v2482_v34, %v2640_v15 }
 0x11e   :  { %v2170_v30 = vpop.eup %2169  ;;  %1387 = vst.msk [vmem:[%s3601_s3 + $0xac] sm:$0xf] %vm1343_vm2, %v1908_v37  ;;  %v2904_v31 = vpack.c.bf16 %v1064_v46, %v1064_v46  ;;  %v1069_v63 = vmul.f32 %v2168_v55, %v2621_v50  ;;  %2189 = vpow2.f32 %v1787_v19  ;;  %1482 = vrot.lane.b32.xlu1 %v1902_v33, %s2322_s29 }
 0x11f   :  { %v2172_v27 = vpop.eup %2171  ;;  %1353 = vst.msk [vmem:[%s3601_s3 + $0x24] sm:$0xf] %vm1343_vm2, %v2897_v17  ;;  %v2914_v38 = vpack.c.bf16 %v1037_v21, %v1037_v21  ;;  %v843_v61 = vadd.f32 1.0, %v2170_v30  ;;  %2191 = vpow2.f32 %v1785_v11 }
 0x120   :  { %v2174_v24 = vpop.eup %2173  ;;  %1385 = vst.msk [vmem:[%s3601_s3 + $0xa4] sm:$0xf] %vm1343_vm2, %v2904_v31  ;;  %v2921_v50 = vpack.c.bf16 %v1069_v63, %v1069_v63  ;;  %v875_v33 = vadd.f32 1.0, %v2172_v27  ;;  %2193 = vpow2.f32 %v1788_v59  ;;  %v1786_v63 = vmul.f32 -1.442695, %v2937_v56 }
 0x121   :  { %v2176_v57 = vpop.eup %2175  ;;  %1358 = vst.msk [vmem:[%s3601_s3 + $0x38] sm:$0xf] %vm1343_vm2, %v2914_v38  ;;  %2195 = vrcp.f32 %v843_v61  ;;  %v846_v28 = vadd.f32 1.0, %v2174_v24  ;;  %1492 = vrot.lane.b32.xlu0 %v1907_v22, %s2322_s29  ;;  %v2945_v22 = vadd.f32 %v2482_v34, %v2692_v42  ;;  %v2953_v27 = vadd.f32 %v2704_v48, %v2482_v34 }
 0x122   :  { %v2178_v49 = vpop.eup %2177  ;;  %1390 = vst.msk [vmem:[%s3601_s3 + $0xb8] sm:$0xf] %vm1343_vm2, %v2921_v50  ;;  %2197 = vrcp.f32 %v875_v33  ;;  %v878_v9 = vadd.f32 1.0, %v2176_v57  ;;  %1430 = vrot.lane.b32.xlu1 %v1876_v10, %s2322_s29  ;;  %v2941_v10 = vadd.f32 %v2682_v35, %v2482_v34  ;;  %v2957_v42 = vadd.f32 %v2482_v34, %v2717_v8 }
 0x123   :  { %v2180_v19 = vpop.eup %2179  ;;  %2199 = vrcp.f32 %v846_v28  ;;  %v844_v3 = vadd.f32 1.0, %v2178_v49  ;;  %v2965_v33 = vadd.f32 %v2482_v34, %v2706_v5  ;;  %v2969_v48 = vadd.f32 %v2719_v45, %v2482_v34 }
 0x124   :  { %v2182_v11 = vpop.eup %2181  ;;  %2201 = vrcp.f32 %v878_v9  ;;  %v876_v44 = vadd.f32 1.0, %v2180_v19  ;;  %v1759_v8 = vmul.f32 -1.442695, %v2941_v10  ;;  %v1757_v49 = vmul.f32 -1.442695, %v2945_v22 }
 0x125   :  { %v2184_v46 = vpop.eup %2183  ;;  %2203 = vrcp.f32 %v844_v3  ;;  %v849_v59 = vadd.f32 1.0, %v2182_v11  ;;  %1424 = vrot.lane.b32.xlu0 %v2864_v62, %s2322_s29  ;;  %v1760_v9 = vmul.f32 -1.442695, %v2953_v27  ;;  %v2980_v45 = vadd.f32 %v2482_v34, %v2726_v14 }
 0x126   :  { %v2186_v55 = vpop.eup %2185  ;;  %2205 = vrcp.f32 %v876_v44  ;;  %v847_v21 = vadd.f32 1.0, %v2184_v46  ;;  %1494 = vrot.lane.b32.xlu1 %v1908_v37, %s2322_s29  ;;  %v2961_v37 = vadd.f32 %v2694_v40, %v2482_v34  ;;  %v1758_v11 = vmul.f32 -1.442695, %v2957_v42 }
 0x127   :  { %v2188_v15 = vpop.eup %2187  ;;  %2207 = vrcp.f32 %v849_v59  ;;  %v850_v30 = vadd.f32 1.0, %v2186_v55  ;;  %v1789_v46 = vmul.f32 -1.442695, %v2965_v33  ;;  %v1792_v59 = vmul.f32 -1.442695, %v2969_v48 }
 0x128   :  { %v2190_v35 = vpop.eup %2189  ;;  %2209 = vrcp.f32 %v847_v21  ;;  %v848_v61 = vadd.f32 1.0, %v2188_v15 }
 0x129   :  { %v2192_v62 = vpop.eup %2191  ;;  %2211 = vrcp.f32 %v850_v30  ;;  %v881_v24 = vadd.f32 1.0, %v2190_v35  ;;  %1488 = vrot.lane.b32.xlu0 %v2872_v2, %s2322_s29  ;;  %v1790_v35 = vmul.f32 -1.442695, %v2980_v45 }
 0x12a   :  { %v2194_v57 = vpop.eup %2193  ;;  %2213 = vrcp.f32 %v848_v61  ;;  %v879_v28 = vadd.f32 1.0, %v2192_v62  ;;  %1426 = vrot.lane.b32.xlu1 %v2897_v17, %s2322_s29  ;;  %v1791_v17 = vmul.f32 -1.442695, %v2961_v37  ;;  %v3018_v62 = vadd.f32 %v2762_v6, %v2482_v34 }
 0x12b   :  { %v2196_v40 = vpop.eup %2195  ;;  %2215 = vrcp.f32 %v881_v24  ;;  %v882_v5 = vadd.f32 1.0, %v2194_v57  ;;  %v3027_v57 = vadd.f32 %v2482_v34, %v2776_v12 }
 0x12c   :  { %v2198_v19 = vpop.eup %2197  ;;  %v1035_v3 = vmul.f32 %v2196_v40, %v2735_v20  ;;  %2217 = vrcp.f32 %v879_v28  ;;  %v2991_v20 = vadd.f32 %v2741_v25, %v2482_v34 }
 0x12d   :  { %v2200_v44 = vpop.eup %2199  ;;  %v1067_v2 = vmul.f32 %v2198_v19, %v2746_v0  ;;  %2219 = vrcp.f32 %v882_v5  ;;  %1436 = vrot.lane.b32.xlu0 %v2914_v38, %s2322_s29  ;;  %v3008_v38 = vadd.f32 %v2482_v34, %v2748_v51  ;;  %v1764_v5 = vmul.f32 -1.442695, %v3018_v62 }
 0x12e   :  { %v2202_v55 = vpop.eup %2201  ;;  %v1877_v21 = vpack.c.bf16 %v1035_v3, %v1035_v3  ;;  %v1038_v14 = vmul.f32 %v2200_v44, %v2754_v43  ;;  %2221 = vpow2.f32 %v1786_v63  ;;  %1490 = vrot.lane.b32.xlu1 %v2904_v31, %s2322_s29  ;;  %v1762_v3 = vmul.f32 -1.442695, %v3027_v57 }
 0x12f   :  { %v2204_v0 = vpop.eup %2203  ;;  %v2997_v15 = vpack.c.bf16 %v1067_v2, %v1067_v2  ;;  %v1070_v30 = vmul.f32 %v2202_v55, %v2758_v54  ;;  %2223 = vpow2.f32 %v1759_v8 }
 0x130   :  { %v2206_v43 = vpop.eup %2205  ;;  %1356 = vst.msk [vmem:[%s3601_s3 + $0x30] sm:$0xf] %vm1343_vm2, %v1877_v21  ;;  %v1880_v25 = vpack.c.bf16 %v1038_v14, %v1038_v14  ;;  %v1036_v31 = vmul.f32 %v2204_v0, %v2768_v16  ;;  %2225 = vpow2.f32 %v1757_v49 }
 0x131   :  { %v2208_v63 = vpop.eup %2207  ;;  %1388 = vst.msk [vmem:[%s3601_s3 + $0xb0] sm:$0xf] %vm1343_vm2, %v2997_v15  ;;  %v1912_v54 = vpack.c.bf16 %v1070_v30, %v1070_v30  ;;  %v1068_v61 = vmul.f32 %v2206_v43, %v2772_v7  ;;  %2227 = vpow2.f32 %v1760_v9  ;;  %1500 = vrot.lane.b32.xlu0 %v2921_v50, %s2322_s29  ;;  %v1761_v50 = vmul.f32 -1.442695, %v3008_v38 }
 0x132   :  { %v2210_v16 = vpop.eup %2209  ;;  %1359 = vst.msk [vmem:[%s3601_s3 + $0x3c] sm:$0xf] %vm1343_vm2, %v1880_v25  ;;  %v1878_v51 = vpack.c.bf16 %v1036_v31, %v1036_v31  ;;  %v1041_v24 = vmul.f32 %v2208_v63, %v2782_v23  ;;  %2229 = vpow2.f32 %v1758_v11  ;;  %1438 = vrot.lane.b32.xlu1 %v1880_v25, %s2322_s29  ;;  %v1763_v23 = vmul.f32 -1.442695, %v2991_v20 }
 0x133   :  { %v2212_v6 = vpop.eup %2211  ;;  %1391 = vst.msk [vmem:[%s3601_s3 + $0xbc] sm:$0xf] %vm1343_vm2, %v1912_v54  ;;  %v1910_v7 = vpack.c.bf16 %v1068_v61, %v1068_v61  ;;  %v1039_v28 = vmul.f32 %v2210_v16, %v2786_v13  ;;  %2231 = vpow2.f32 %v1791_v17 }
 0x134   :  { %v2214_v8 = vpop.eup %2213  ;;  %1357 = vst.msk [vmem:[%s3601_s3 + $0x34] sm:$0xf] %vm1343_vm2, %v1878_v51  ;;  %v1883_v34 = vpack.c.bf16 %v1041_v24, %v1041_v24  ;;  %v1042_v12 = vmul.f32 %v2212_v6, %v2793_v60  ;;  %2233 = vpow2.f32 %v1789_v46 }
 0x135   :  { %v2216_v49 = vpop.eup %2215  ;;  %1389 = vst.msk [vmem:[%s3601_s3 + $0xb4] sm:$0xf] %vm1343_vm2, %v1910_v7  ;;  %v3048_v13 = vpack.c.bf16 %v1039_v28, %v1039_v28  ;;  %v1040_v40 = vmul.f32 %v2214_v8, %v2818_v47  ;;  %2235 = vpow2.f32 %v1792_v59  ;;  %1432 = vrot.lane.b32.xlu0 %v1877_v21, %s2322_s29 }
 0x136   :  { %v2218_v9 = vpop.eup %2217  ;;  %1362 = vst.msk [vmem:[%s3601_s3 + $0x48] sm:$0xf] %vm1343_vm2, %v1883_v34  ;;  %v3056_v60 = vpack.c.bf16 %v1042_v12, %v1042_v12  ;;  %v1073_v19 = vmul.f32 %v2216_v49, %v2831_v52  ;;  %2237 = vpow2.f32 %v1790_v35  ;;  %1502 = vrot.lane.b32.xlu1 %v1912_v54, %s2322_s29 }
 0x137   :  { %v2220_v47 = vpop.eup %2219  ;;  %1360 = vst.msk [vmem:[%s3601_s3 + $0x40] sm:$0xf] %vm1343_vm2, %v3048_v13  ;;  %v3067_v11 = vpack.c.bf16 %v1040_v40, %v1040_v40  ;;  %v1071_v17 = vmul.f32 %v2218_v9, %v2847_v32  ;;  %2239 = vpow2.f32 %v1763_v23  ;;  %v3606_v23 = vld [vmem:[#allocation2_spill] sm:$0xff] }
 0x138   :  { %v2222_v52 = vpop.eup %2221  ;;  %1363 = vst.msk [vmem:[%s3601_s3 + $0x4c] sm:$0xf] %vm1343_vm2, %v3056_v60  ;;  %v1915_v44 = vpack.c.bf16 %v1073_v19, %v1073_v19  ;;  %v1074_v2 = vmul.f32 %v2220_v47, %v2858_v58  ;;  %2241 = vpow2.f32 %v1761_v50 }
 0x139   :  { %v2224_v46 = vpop.eup %2223  ;;  %1361 = vst.msk [vmem:[%s3601_s3 + $0x44] sm:$0xf] %vm1343_vm2, %v3067_v11  ;;  %v3081_v32 = vpack.c.bf16 %v1071_v17, %v1071_v17  ;;  %v880_v59 = vadd.f32 1.0, %v2222_v52  ;;  %2243 = vpow2.f32 %v1764_v5  ;;  %1496 = vrot.lane.b32.xlu0 %v2997_v15, %s2322_s29 }
 0x13a   :  { %v2226_v55 = vpop.eup %2225  ;;  %1394 = vst.msk [vmem:[%s3601_s3 + $0xc8] sm:$0xf] %vm1343_vm2, %v1915_v44  ;;  %v1916_v21 = vpack.c.bf16 %v1074_v2, %v1074_v2  ;;  %v853_v58 = vadd.f32 1.0, %v2224_v46  ;;  %2245 = vpow2.f32 %v1762_v3  ;;  %1434 = vrot.lane.b32.xlu1 %v1878_v51, %s2322_s29  ;;  %v3104_v51 = vld [vmem:[%s3600_s2] ss:$0 sm:$0xff] }
 0x13b   :  { %v2228_v14 = vpop.eup %2227  ;;  %1392 = vst.msk [vmem:[%s3601_s3 + $0xc0] sm:$0xf] %vm1343_vm2, %v3081_v32  ;;  %2247 = vrcp.f32 %v880_v59  ;;  %v851_v0 = vadd.f32 1.0, %v2226_v55  ;;  %v3108_v24 = vadd.f32 %v3104_v51, %v2750_v39  ;;  %v3112_v6 = vadd.f32 %v3104_v51, %v2764_v1  ;;  %v3608_v39 = vld [vmem:[#allocation4_spill] sm:$0xff] }
 0x13c   :  { %v2230_v30 = vpop.eup %2229  ;;  %1395 = vst.msk [vmem:[%s3601_s3 + $0xcc] sm:$0xf] %vm1343_vm2, %v1916_v21  ;;  %2249 = vrcp.f32 %v853_v58  ;;  %v854_v35 = vadd.f32 1.0, %v2228_v14  ;;  %v3116_v8 = vadd.f32 %v3104_v51, %v3606_v23  ;;  %v3124_v40 = vadd.f32 %v3104_v51, %v3608_v39 }
 0x13d   :  { %v2232_v43 = vpop.eup %2231  ;;  %2251 = vrcp.f32 %v851_v0  ;;  %v852_v15 = vadd.f32 1.0, %v2230_v30  ;;  %1444 = vrot.lane.b32.xlu0 %v1883_v34, %s2322_s29  ;;  %v3607_v34 = vld [vmem:[#allocation3_spill] sm:$0xff]  ;;  %v3128_v1 = vadd.f32 %v3104_v51, %v2811_v18  ;;  %v3135_v19 = vadd.f32 %v3104_v51, %v2820_v53 }
 0x13e   :  { %v2234_v25 = vpop.eup %2233  ;;  %2253 = vrcp.f32 %v854_v35  ;;  %v885_v31 = vadd.f32 1.0, %v2232_v43  ;;  %1498 = vrot.lane.b32.xlu1 %v1910_v7, %s2322_s29  ;;  %v3120_v12 = vadd.f32 %v3104_v51, %v3607_v34  ;;  %v3139_v3 = vadd.f32 %v3104_v51, %v2836_v36 }
 0x13f   :  { %v2236_v63 = vpop.eup %2235  ;;  %2255 = vrcp.f32 %v852_v15  ;;  %v883_v54 = vadd.f32 1.0, %v2234_v25  ;;  %v1795_v17 = vmul.f32 -1.442695, %v3108_v24  ;;  %v1796_v2 = vmul.f32 -1.442695, %v3116_v8 }
 0x140   :  { %v2238_v61 = vpop.eup %2237  ;;  %2257 = vrcp.f32 %v885_v31  ;;  %v886_v16 = vadd.f32 1.0, %v2236_v63  ;;  %v1794_v46 = vmul.f32 -1.442695, %v3120_v12  ;;  %v1767_v36 = vmul.f32 -1.442695, %v3124_v40 }
 0x141   :  { %v2240_v7 = vpop.eup %2239  ;;  %2259 = vrcp.f32 %v883_v54  ;;  %v884_v28 = vadd.f32 1.0, %v2238_v61  ;;  %1508 = vrot.lane.b32.xlu0 %v1915_v44, %s2322_s29  ;;  %v1765_v55 = vmul.f32 -1.442695, %v3128_v1  ;;  %v1768_v0 = vmul.f32 -1.442695, %v3135_v19 }
 0x142   :  { %v2242_v50 = vpop.eup %2241  ;;  %2261 = vrcp.f32 %v886_v16  ;;  %v857_v49 = vadd.f32 1.0, %v2240_v7  ;;  %1446 = vrot.lane.b32.xlu1 %v3056_v60, %s2322_s29  ;;  %v1793_v60 = vmul.f32 -1.442695, %v3112_v6  ;;  %v1766_v30 = vmul.f32 -1.442695, %v3139_v3 }
 0x143   :  { %v2244_v5 = vpop.eup %2243  ;;  %2263 = vrcp.f32 %v884_v28  ;;  %v855_v9 = vadd.f32 1.0, %v2242_v50  ;;  %v3157_v15 = vadd.f32 %v3104_v51, %v2813_v29  ;;  %v3173_v63 = vadd.f32 %v3104_v51, %v2838_v26 }
 0x144   :  { %v2246_v47 = vpop.eup %2245  ;;  %2265 = vrcp.f32 %v857_v49  ;;  %v858_v18 = vadd.f32 1.0, %v2244_v5  ;;  %v3186_v26 = vadd.f32 %v3104_v51, %v2849_v41 }
 0x145   :  { %v2248_v52 = vpop.eup %2247  ;;  %2267 = vrcp.f32 %v855_v9  ;;  %v856_v44 = vadd.f32 1.0, %v2246_v47  ;;  %1440 = vrot.lane.b32.xlu0 %v3048_v13, %s2322_s29  ;;  %v1799_v61 = vmul.f32 -1.442695, %v3157_v15  ;;  %v1800_v23 = vmul.f32 -1.442695, %v3173_v63 }
 0x146   :  { %v2250_v53 = vpop.eup %2249  ;;  %v1072_v59 = vmul.f32 %v2248_v52, %v2937_v56  ;;  %2269 = vrcp.f32 %v858_v18  ;;  %1510 = vrot.lane.b32.xlu1 %v1916_v21, %s2322_s29  ;;  %v1798_v49 = vmul.f32 -1.442695, %v3186_v26 }
 0x147   :  { %v2252_v58 = vpop.eup %2251  ;;  %v1045_v14 = vmul.f32 %v2250_v53, %v2941_v10  ;;  %2271 = vrcp.f32 %v856_v44  ;;  %v3162_v10 = vadd.f32 %v3104_v51, %v2822_v4 }
 0x148   :  { %v2254_v35 = vpop.eup %2253  ;;  %v1914_v56 = vpack.c.bf16 %v1072_v59, %v1072_v59  ;;  %v1043_v43 = vmul.f32 %v2252_v58, %v2945_v22  ;;  %2273 = vpow2.f32 %v1795_v17 }
 0x149   :  { %v2256_v21 = vpop.eup %2255  ;;  %v1887_v25 = vpack.c.bf16 %v1045_v14, %v1045_v14  ;;  %v1046_v13 = vmul.f32 %v2254_v35, %v2953_v27  ;;  %2275 = vpow2.f32 %v1793_v60  ;;  %1504 = vrot.lane.b32.xlu0 %v3081_v32, %s2322_s29  ;;  %v1797_v51 = vmul.f32 -1.442695, %v3162_v10 }
 0x14a   :  { %v2258_v31 = vpop.eup %2257  ;;  %1393 = vst.msk [vmem:[%s3601_s3 + $0xc4] sm:$0xf] %vm1343_vm2, %v1914_v56  ;;  %v3168_v22 = vpack.c.bf16 %v1043_v43, %v1043_v43  ;;  %v1044_v29 = vmul.f32 %v2256_v21, %v2957_v42  ;;  %2277 = vpow2.f32 %v1796_v2  ;;  %1442 = vrot.lane.b32.xlu1 %v3067_v11, %s2322_s29 }
 0x14b   :  { %v2260_v4 = vpop.eup %2259  ;;  %1366 = vst.msk [vmem:[%s3601_s3 + $0x58] sm:$0xf] %vm1343_vm2, %v1887_v25  ;;  %v1888_v27 = vpack.c.bf16 %v1046_v13, %v1046_v13  ;;  %v1077_v42 = vmul.f32 %v2258_v31, %v2961_v37  ;;  %2279 = vpow2.f32 %v1794_v46 }
 0x14c   :  { %v2262_v54 = vpop.eup %2261  ;;  %1364 = vst.msk [vmem:[%s3601_s3 + $0x50] sm:$0xf] %vm1343_vm2, %v3168_v22  ;;  %v3193_v11 = vpack.c.bf16 %v1044_v29, %v1044_v29  ;;  %v1075_v32 = vmul.f32 %v2260_v4, %v2965_v33  ;;  %2281 = vpow2.f32 %v1767_v36 }
 0x14d   :  { %v2264_v37 = vpop.eup %2263  ;;  %1367 = vst.msk [vmem:[%s3601_s3 + $0x5c] sm:$0xf] %vm1343_vm2, %v1888_v27  ;;  %v1919_v41 = vpack.c.bf16 %v1077_v42, %v1077_v42  ;;  %v1078_v16 = vmul.f32 %v2262_v54, %v2969_v48  ;;  %2283 = vpow2.f32 %v1765_v55  ;;  %1452 = vrot.lane.b32.xlu0 %v1887_v25, %s2322_s29 }
 0x14e   :  { %v2266_v7 = vpop.eup %2265  ;;  %1365 = vst.msk [vmem:[%s3601_s3 + $0x54] sm:$0xf] %vm1343_vm2, %v3193_v11  ;;  %v1917_v33 = vpack.c.bf16 %v1075_v32, %v1075_v32  ;;  %v1076_v28 = vmul.f32 %v2264_v37, %v2980_v45  ;;  %2285 = vpow2.f32 %v1768_v0  ;;  %1506 = vrot.lane.b32.xlu1 %v1914_v56, %s2322_s29 }
 0x14f   :  { %v2268_v48 = vpop.eup %2267  ;;  %1398 = vst.msk [vmem:[%s3601_s3 + $0xd8] sm:$0xf] %vm1343_vm2, %v1919_v41  ;;  %v1920_v34 = vpack.c.bf16 %v1078_v16, %v1078_v16  ;;  %v1049_v50 = vmul.f32 %v2266_v7, %v2991_v20  ;;  %2287 = vpow2.f32 %v1766_v30 }
 0x150   :  { %v2270_v45 = vpop.eup %2269  ;;  %1396 = vst.msk [vmem:[%s3601_s3 + $0xd0] sm:$0xf] %vm1343_vm2, %v1917_v33  ;;  %v1918_v39 = vpack.c.bf16 %v1076_v28, %v1076_v28  ;;  %v1047_v5 = vmul.f32 %v2268_v48, %v3008_v38  ;;  %2289 = vpow2.f32 %v1799_v61 }
 0x151   :  { %v2272_v9 = vpop.eup %2271  ;;  %1399 = vst.msk [vmem:[%s3601_s3 + $0xdc] sm:$0xf] %vm1343_vm2, %v1920_v34  ;;  %v1891_v20 = vpack.c.bf16 %v1049_v50, %v1049_v50  ;;  %v1050_v47 = vmul.f32 %v2270_v45, %v3018_v62  ;;  %2291 = vpow2.f32 %v1797_v51  ;;  %1516 = vrot.lane.b32.xlu0 %v1919_v41, %s2322_s29 }
 0x152   :  { %v2274_v18 = vpop.eup %2273  ;;  %1397 = vst.msk [vmem:[%s3601_s3 + $0xd4] sm:$0xf] %vm1343_vm2, %v1918_v39  ;;  %v3232_v17 = vpack.c.bf16 %v1047_v5, %v1047_v5  ;;  %v1048_v38 = vmul.f32 %v2272_v9, %v3027_v57  ;;  %2293 = vpow2.f32 %v1800_v23  ;;  %1454 = vrot.lane.b32.xlu1 %v1888_v27, %s2322_s29 }
 0x153   :  { %v2276_v60 = vpop.eup %2275  ;;  %1370 = vst.msk [vmem:[%s3601_s3 + $0x68] sm:$0xf] %vm1343_vm2, %v1891_v20  ;;  %v1892_v62 = vpack.c.bf16 %v1050_v47, %v1050_v47  ;;  %v889_v52 = vadd.f32 1.0, %v2274_v18  ;;  %2295 = vpow2.f32 %v1798_v49 }
 0x154   :  { %v2278_v44 = vpop.eup %2277  ;;  %1368 = vst.msk [vmem:[%s3601_s3 + $0x60] sm:$0xf] %vm1343_vm2, %v3232_v17  ;;  %v3246_v57 = vpack.c.bf16 %v1048_v38, %v1048_v38  ;;  %v887_v2 = vadd.f32 1.0, %v2276_v60 }
 0x155   :  { %v2280_v46 = vpop.eup %2279  ;;  %1371 = vst.msk [vmem:[%s3601_s3 + $0x6c] sm:$0xf] %vm1343_vm2, %v1892_v62  ;;  %2297 = vrcp.f32 %v889_v52  ;;  %v890_v53 = vadd.f32 1.0, %v2278_v44  ;;  %1448 = vrot.lane.b32.xlu0 %v3168_v22, %s2322_s29 }
 0x156   :  { %v2282_v59 = vpop.eup %2281  ;;  %1369 = vst.msk [vmem:[%s3601_s3 + $0x64] sm:$0xf] %vm1343_vm2, %v3246_v57  ;;  %2299 = vrcp.f32 %v887_v2  ;;  %v888_v36 = vadd.f32 1.0, %v2280_v46  ;;  %1518 = vrot.lane.b32.xlu1 %v1920_v34, %s2322_s29 }
 0x157   :  { %v2284_v55 = vpop.eup %2283  ;;  %2301 = vrcp.f32 %v890_v53  ;;  %v861_v58 = vadd.f32 1.0, %v2282_v59 }
 0x158   :  { %v2286_v14 = vpop.eup %2285  ;;  %2303 = vrcp.f32 %v888_v36  ;;  %v859_v0 = vadd.f32 1.0, %v2284_v55 }
 0x159   :  { %v2288_v30 = vpop.eup %2287  ;;  %2305 = vrcp.f32 %v861_v58  ;;  %v862_v35 = vadd.f32 1.0, %v2286_v14  ;;  %1512 = vrot.lane.b32.xlu0 %v1917_v33, %s2322_s29 }
 0x15a   :  { %v2290_v56 = vpop.eup %2289  ;;  %2307 = vrcp.f32 %v859_v0  ;;  %v860_v43 = vadd.f32 1.0, %v2288_v30  ;;  %1450 = vrot.lane.b32.xlu1 %v3193_v11, %s2322_s29 }
 0x15b   :  { %v2292_v21 = vpop.eup %2291  ;;  %2309 = vrcp.f32 %v862_v35  ;;  %v893_v25 = vadd.f32 1.0, %v2290_v56 }
 0x15c   :  { %v2294_v13 = vpop.eup %2293  ;;  %2311 = vrcp.f32 %v860_v43  ;;  %v891_v31 = vadd.f32 1.0, %v2292_v21 }
 0x15d   :  { %v2296_v22 = vpop.eup %2295  ;;  %2313 = vrcp.f32 %v893_v25  ;;  %v894_v29 = vadd.f32 1.0, %v2294_v13  ;;  %1460 = vrot.lane.b32.xlu0 %v1891_v20, %s2322_s29 }
 0x15e   :  { %2315 = vrcp.f32 %v891_v31  ;;  %v892_v4 = vadd.f32 1.0, %v2296_v22  ;;  %1514 = vrot.lane.b32.xlu1 %v1918_v39, %s2322_s29 }
 0x15f   :  { %v2298_v27 = vpop.eup %2297  ;;  %2317 = vrcp.f32 %v894_v29 }
 0x160   :  { %v2300_v42 = vpop.eup %2299  ;;  %v1081_v54 = vmul.f32 %v2298_v27, %v3108_v24  ;;  %2319 = vrcp.f32 %v892_v4 }
 0x161   :  { %v2302_v11 = vpop.eup %2301  ;;  %v1079_v32 = vmul.f32 %v2300_v42, %v3112_v6 }
 0x162   :  { %v2304_v61 = vpop.eup %2303  ;;  %v1923_v37 = vpack.c.bf16 %v1081_v54, %v1081_v54  ;;  %v1082_v41 = vmul.f32 %v2302_v11, %v3116_v8  ;;  %1462 = vrot.lane.b32.xlu1 %v1892_v62, %s2322_s29 }
 0x163   :  { %v2306_v16 = vpop.eup %2305  ;;  %v1921_v51 = vpack.c.bf16 %v1079_v32, %v1079_v32  ;;  %v1080_v7 = vmul.f32 %v2304_v61, %v3120_v12 }
 0x164   :  { %v2308_v33 = vpop.eup %2307  ;;  %1402 = vst.msk [vmem:[%s3601_s3 + $0xe8] sm:$0xf] %vm1343_vm2, %v1923_v37  ;;  %v1924_v24 = vpack.c.bf16 %v1082_v41, %v1082_v41  ;;  %v1053_v28 = vmul.f32 %v2306_v16, %v3124_v40  ;;  %1524 = vrot.lane.b32.xlu0 %v1923_v37, %s2322_s29 }
 0x165   :  { %v2310_v6 = vpop.eup %2309  ;;  %1400 = vst.msk [vmem:[%s3601_s3 + $0xe0] sm:$0xf] %vm1343_vm2, %v1921_v51  ;;  %v1922_v8 = vpack.c.bf16 %v1080_v7, %v1080_v7  ;;  %v1051_v12 = vmul.f32 %v2308_v33, %v3128_v1 }
 0x166   :  { %v2312_v23 = vpop.eup %2311  ;;  %1403 = vst.msk [vmem:[%s3601_s3 + $0xec] sm:$0xf] %vm1343_vm2, %v1924_v24  ;;  %v1895_v48 = vpack.c.bf16 %v1053_v28, %v1053_v28  ;;  %v1054_v40 = vmul.f32 %v2310_v6, %v3135_v19  ;;  %1526 = vrot.lane.b32.xlu1 %v1924_v24, %s2322_s29 }
 0x167   :  { %v2314_v34 = vpop.eup %2313  ;;  %1401 = vst.msk [vmem:[%s3601_s3 + $0xe4] sm:$0xf] %vm1343_vm2, %v1922_v8  ;;  %v1893_v50 = vpack.c.bf16 %v1051_v12, %v1051_v12  ;;  %v1052_v1 = vmul.f32 %v2312_v23, %v3139_v3 }
 0x168   :  { %v2316_v49 = vpop.eup %2315  ;;  %1374 = vst.msk [vmem:[%s3601_s3 + $0x78] sm:$0xf] %vm1343_vm2, %v1895_v48  ;;  %v1896_v45 = vpack.c.bf16 %v1054_v40, %v1054_v40  ;;  %v1085_v19 = vmul.f32 %v2314_v34, %v3157_v15  ;;  %1456 = vrot.lane.b32.xlu0 %v3232_v17, %s2322_s29 }
 0x169   :  { %v2318_v39 = vpop.eup %2317  ;;  %1372 = vst.msk [vmem:[%s3601_s3 + $0x70] sm:$0xf] %vm1343_vm2, %v1893_v50  ;;  %v1894_v5 = vpack.c.bf16 %v1052_v1, %v1052_v1  ;;  %v1083_v3 = vmul.f32 %v2316_v49, %v3162_v10 }
 0x16a   :  { %v2320_v9 = vpop.eup %2319  ;;  %1375 = vst.msk [vmem:[%s3601_s3 + $0x7c] sm:$0xf] %vm1343_vm2, %v1896_v45  ;;  %v1927_v20 = vpack.c.bf16 %v1085_v19, %v1085_v19  ;;  %v1086_v15 = vmul.f32 %v2318_v39, %v3173_v63  ;;  %1458 = vrot.lane.b32.xlu1 %v3246_v57, %s2322_s29 }
 0x16b   :  { %1373 = vst.msk [vmem:[%s3601_s3 + $0x74] sm:$0xf] %vm1343_vm2, %v1894_v5  ;;  %v1925_v47 = vpack.c.bf16 %v1083_v3, %v1083_v3  ;;  %v1084_v10 = vmul.f32 %v2320_v9, %v3186_v26 }
 0x16c   :  { %1406 = vst.msk [vmem:[%s3601_s3 + $0xf8] sm:$0xf] %vm1343_vm2, %v1927_v20  ;;  %v1928_v18 = vpack.c.bf16 %v1086_v15, %v1086_v15  ;;  %1520 = vrot.lane.b32.xlu0 %v1921_v51, %s2322_s29 }
 0x16d   :  { %1404 = vst.msk [vmem:[%s3601_s3 + $0xf0] sm:$0xf] %vm1343_vm2, %v1925_v47  ;;  %v1926_v63 = vpack.c.bf16 %v1084_v10, %v1084_v10 }
 0x16e   :  { %1407 = vst.msk [vmem:[%s3601_s3 + $0xfc] sm:$0xf] %vm1343_vm2, %v1928_v18  ;;  %1522 = vrot.lane.b32.xlu1 %v1922_v8, %s2322_s29  ;;  %v1413_v17 = vpop.permute.xlu1 %1412 }
 0x16f   :  { %1405 = vst.msk [vmem:[%s3601_s3 + $0xf4] sm:$0xf] %vm1343_vm2, %v1926_v63  ;;  %v1477_v26 = vpop.permute.xlu0 %1476  ;;  %1602 = vst.msk [vmem:[%s3602_s4 + $0x8] sm:$0xf] %vm1343_vm2, %v1413_v17 }
 0x170   :  { %1468 = vrot.lane.b32.xlu0 %v1895_v48, %s2322_s29  ;;  %1634 = vst.msk [vmem:[%s3602_s4 + $0x88] sm:$0xf] %vm1343_vm2, %v1477_v26 }
 0x172   :  { %1470 = vrot.lane.b32.xlu1 %v1896_v45, %s2322_s29  ;;  %v1415_v60 = vpop.permute.xlu1 %1414 }
 0x173   :  { %v1409_v38 = vpop.permute.xlu0 %1408  ;;  %1603 = vst.msk [vmem:[%s3602_s4 + $0xc] sm:$0xf] %vm1343_vm2, %v1415_v60 }
 0x174   :  { %1464 = vrot.lane.b32.xlu0 %v1893_v50, %s2322_s29  ;;  %1600 = vst.msk [vmem:[%s3602_s4] sm:$0xf] %vm1343_vm2, %v1409_v38 }
 0x176   :  { %1466 = vrot.lane.b32.xlu1 %v1894_v5, %s2322_s29  ;;  %v1479_v52 = vpop.permute.xlu1 %1478 }
 0x177   :  { %v1473_v62 = vpop.permute.xlu0 %1472  ;;  %1635 = vst.msk [vmem:[%s3602_s4 + $0x8c] sm:$0xf] %vm1343_vm2, %v1479_v52 }
 0x178   :  { %1528 = vrot.lane.b32.xlu0 %v1925_v47, %s2322_s29  ;;  %1632 = vst.msk [vmem:[%s3602_s4 + $0x80] sm:$0xf] %vm1343_vm2, %v1473_v62 }
 0x17a   :  { %1530 = vrot.lane.b32.xlu1 %v1926_v63, %s2322_s29  ;;  %v1475_v57 = vpop.permute.xlu1 %1474 }
 0x17b   :  { %v1411_v44 = vpop.permute.xlu0 %1410  ;;  %1633 = vst.msk [vmem:[%s3602_s4 + $0x84] sm:$0xf] %vm1343_vm2, %v1475_v57 }
 0x17c   :  { %1532 = vrot.lane.b32.xlu0 %v1927_v20, %s2322_s29  ;;  %1601 = vst.msk [vmem:[%s3602_s4 + $0x4] sm:$0xf] %vm1343_vm2, %v1411_v44 }
 0x17e   :  { %1534 = vrot.lane.b32.xlu1 %v1928_v18, %s2322_s29  ;;  %v1423_v46 = vpop.permute.xlu1 %1422 }
 0x17f   :  { %v1421_v2 = vpop.permute.xlu0 %1420  ;;  %1607 = vst.msk [vmem:[%s3602_s4 + $0x1c] sm:$0xf] %vm1343_vm2, %v1423_v46 }
 0x180   :  { %1606 = vst.msk [vmem:[%s3602_s4 + $0x18] sm:$0xf] %vm1343_vm2, %v1421_v2 }
 0x183   :  { %v1485_v53 = vpop.permute.xlu0 %1484 }
 0x184   :  { %1638 = vst.msk [vmem:[%s3602_s4 + $0x98] sm:$0xf] %vm1343_vm2, %v1485_v53 }
 0x187   :  { %v1417_v36 = vpop.permute.xlu0 %1416 }
 0x188   :  { %v1487_v59 = vpop.permute.xlu1 %1486  ;;  %1604 = vst.msk [vmem:[%s3602_s4 + $0x10] sm:$0xf] %vm1343_vm2, %v1417_v36 }
 0x189   :  { %1639 = vst.msk [vmem:[%s3602_s4 + $0x9c] sm:$0xf] %vm1343_vm2, %v1487_v59 }
 0x18b   :  { %v1481_v58 = vpop.permute.xlu0 %1480 }
 0x18c   :  { %v1419_v55 = vpop.permute.xlu1 %1418  ;;  %1636 = vst.msk [vmem:[%s3602_s4 + $0x90] sm:$0xf] %vm1343_vm2, %v1481_v58 }
 0x18d   :  { %1605 = vst.msk [vmem:[%s3602_s4 + $0x14] sm:$0xf] %vm1343_vm2, %v1419_v55 }
 0x18f   :  { %v1429_v0 = vpop.permute.xlu0 %1428 }
 0x190   :  { %v1483_v14 = vpop.permute.xlu1 %1482  ;;  %1610 = vst.msk [vmem:[%s3602_s4 + $0x28] sm:$0xf] %vm1343_vm2, %v1429_v0 }
 0x191   :  { %1637 = vst.msk [vmem:[%s3602_s4 + $0x94] sm:$0xf] %vm1343_vm2, %v1483_v14 }
 0x193   :  { %v1493_v35 = vpop.permute.xlu0 %1492 }
 0x194   :  { %v1431_v30 = vpop.permute.xlu1 %1430  ;;  %1642 = vst.msk [vmem:[%s3602_s4 + $0xa8] sm:$0xf] %vm1343_vm2, %v1493_v35 }
 0x195   :  { %1611 = vst.msk [vmem:[%s3602_s4 + $0x2c] sm:$0xf] %vm1343_vm2, %v1431_v30 }
 0x197   :  { %v1425_v43 = vpop.permute.xlu0 %1424 }
 0x198   :  { %v1495_v56 = vpop.permute.xlu1 %1494  ;;  %1608 = vst.msk [vmem:[%s3602_s4 + $0x20] sm:$0xf] %vm1343_vm2, %v1425_v43 }
 0x199   :  { %1643 = vst.msk [vmem:[%s3602_s4 + $0xac] sm:$0xf] %vm1343_vm2, %v1495_v56 }
 0x19b   :  { %v1489_v25 = vpop.permute.xlu0 %1488 }
 0x19c   :  { %v1427_v21 = vpop.permute.xlu1 %1426  ;;  %1640 = vst.msk [vmem:[%s3602_s4 + $0xa0] sm:$0xf] %vm1343_vm2, %v1489_v25 }
 0x19d   :  { %1609 = vst.msk [vmem:[%s3602_s4 + $0x24] sm:$0xf] %vm1343_vm2, %v1427_v21 }
 0x19f   :  { %v1437_v31 = vpop.permute.xlu0 %1436 }
 0x1a0   :  { %v1491_v13 = vpop.permute.xlu1 %1490  ;;  %1614 = vst.msk [vmem:[%s3602_s4 + $0x38] sm:$0xf] %vm1343_vm2, %v1437_v31 }
 0x1a1   :  { %1641 = vst.msk [vmem:[%s3602_s4 + $0xa4] sm:$0xf] %vm1343_vm2, %v1491_v13 }
 0x1a3   :  { %v1501_v29 = vpop.permute.xlu0 %1500 }
 0x1a4   :  { %v1439_v22 = vpop.permute.xlu1 %1438  ;;  %1646 = vst.msk [vmem:[%s3602_s4 + $0xb8] sm:$0xf] %vm1343_vm2, %v1501_v29 }
 0x1a5   :  { %1615 = vst.msk [vmem:[%s3602_s4 + $0x3c] sm:$0xf] %vm1343_vm2, %v1439_v22 }
 0x1a7   :  { %v1433_v27 = vpop.permute.xlu0 %1432 }
 0x1a8   :  { %v1503_v4 = vpop.permute.xlu1 %1502  ;;  %1612 = vst.msk [vmem:[%s3602_s4 + $0x30] sm:$0xf] %vm1343_vm2, %v1433_v27 }
 0x1a9   :  { %1647 = vst.msk [vmem:[%s3602_s4 + $0xbc] sm:$0xf] %vm1343_vm2, %v1503_v4 }
 0x1ab   :  { %v1497_v54 = vpop.permute.xlu0 %1496 }
 0x1ac   :  { %v1435_v42 = vpop.permute.xlu1 %1434  ;;  %1644 = vst.msk [vmem:[%s3602_s4 + $0xb0] sm:$0xf] %vm1343_vm2, %v1497_v54 }
 0x1ad   :  { %1613 = vst.msk [vmem:[%s3602_s4 + $0x34] sm:$0xf] %vm1343_vm2, %v1435_v42 }
 0x1af   :  { %v1445_v32 = vpop.permute.xlu0 %1444 }
 0x1b0   :  { %v1499_v11 = vpop.permute.xlu1 %1498  ;;  %1618 = vst.msk [vmem:[%s3602_s4 + $0x48] sm:$0xf] %vm1343_vm2, %v1445_v32 }
 0x1b1   :  { %1645 = vst.msk [vmem:[%s3602_s4 + $0xb4] sm:$0xf] %vm1343_vm2, %v1499_v11 }
 0x1b3   :  { %v1509_v37 = vpop.permute.xlu0 %1508 }
 0x1b4   :  { %v1447_v61 = vpop.permute.xlu1 %1446  ;;  %1650 = vst.msk [vmem:[%s3602_s4 + $0xc8] sm:$0xf] %vm1343_vm2, %v1509_v37 }
 0x1b5   :  { %1619 = vst.msk [vmem:[%s3602_s4 + $0x4c] sm:$0xf] %vm1343_vm2, %v1447_v61 }
 0x1b7   :  { %v1441_v16 = vpop.permute.xlu0 %1440 }
 0x1b8   :  { %v1511_v41 = vpop.permute.xlu1 %1510  ;;  %1616 = vst.msk [vmem:[%s3602_s4 + $0x40] sm:$0xf] %vm1343_vm2, %v1441_v16 }
 0x1b9   :  { %1651 = vst.msk [vmem:[%s3602_s4 + $0xcc] sm:$0xf] %vm1343_vm2, %v1511_v41 }
 0x1bb   :  { %v1505_v7 = vpop.permute.xlu0 %1504 }
 0x1bc   :  { %v1443_v51 = vpop.permute.xlu1 %1442  ;;  %1648 = vst.msk [vmem:[%s3602_s4 + $0xc0] sm:$0xf] %vm1343_vm2, %v1505_v7 }
 0x1bd   :  { %1617 = vst.msk [vmem:[%s3602_s4 + $0x44] sm:$0xf] %vm1343_vm2, %v1443_v51 }
 0x1bf   :  { %v1453_v24 = vpop.permute.xlu0 %1452 }
 0x1c0   :  { %v1507_v33 = vpop.permute.xlu1 %1506  ;;  %1622 = vst.msk [vmem:[%s3602_s4 + $0x58] sm:$0xf] %vm1343_vm2, %v1453_v24 }
 0x1c1   :  { %1649 = vst.msk [vmem:[%s3602_s4 + $0xc4] sm:$0xf] %vm1343_vm2, %v1507_v33 }
 0x1c3   :  { %v1517_v6 = vpop.permute.xlu0 %1516 }
 0x1c4   :  { %v1455_v28 = vpop.permute.xlu1 %1454  ;;  %1654 = vst.msk [vmem:[%s3602_s4 + $0xd8] sm:$0xf] %vm1343_vm2, %v1517_v6 }
 0x1c5   :  { %1623 = vst.msk [vmem:[%s3602_s4 + $0x5c] sm:$0xf] %vm1343_vm2, %v1455_v28 }
 0x1c7   :  { %v1449_v12 = vpop.permute.xlu0 %1448 }
 0x1c8   :  { %v1519_v8 = vpop.permute.xlu1 %1518  ;;  %1620 = vst.msk [vmem:[%s3602_s4 + $0x50] sm:$0xf] %vm1343_vm2, %v1449_v12 }
 0x1c9   :  { %1655 = vst.msk [vmem:[%s3602_s4 + $0xdc] sm:$0xf] %vm1343_vm2, %v1519_v8 }
 0x1cb   :  { %v1513_v48 = vpop.permute.xlu0 %1512 }
 0x1cc   :  { %v1451_v23 = vpop.permute.xlu1 %1450  ;;  %1652 = vst.msk [vmem:[%s3602_s4 + $0xd0] sm:$0xf] %vm1343_vm2, %v1513_v48 }
 0x1cd   :  { %1621 = vst.msk [vmem:[%s3602_s4 + $0x54] sm:$0xf] %vm1343_vm2, %v1451_v23 }
 0x1cf   :  { %v1461_v34 = vpop.permute.xlu0 %1460 }
 0x1d0   :  { %v1515_v40 = vpop.permute.xlu1 %1514  ;;  %1626 = vst.msk [vmem:[%s3602_s4 + $0x68] sm:$0xf] %vm1343_vm2, %v1461_v34 }
 0x1d1   :  { %1653 = vst.msk [vmem:[%s3602_s4 + $0xd4] sm:$0xf] %vm1343_vm2, %v1515_v40 }
 0x1d4   :  { %v1463_v50 = vpop.permute.xlu1 %1462 }
 0x1d5   :  { %1627 = vst.msk [vmem:[%s3602_s4 + $0x6c] sm:$0xf] %vm1343_vm2, %v1463_v50 }
 0x1d6   :  { %v1525_v1 = vpop.permute.xlu0 %1524 }
 0x1d7   :  { %1658 = vst.msk [vmem:[%s3602_s4 + $0xe8] sm:$0xf] %vm1343_vm2, %v1525_v1 }
 0x1d8   :  { %v1527_v49 = vpop.permute.xlu1 %1526 }
 0x1d9   :  { %1659 = vst.msk [vmem:[%s3602_s4 + $0xec] sm:$0xf] %vm1343_vm2, %v1527_v49 }
 0x1da   :  { %v1457_v45 = vpop.permute.xlu0 %1456 }
 0x1db   :  { %1624 = vst.msk [vmem:[%s3602_s4 + $0x60] sm:$0xf] %vm1343_vm2, %v1457_v45 }
 0x1dc   :  { %v1459_v19 = vpop.permute.xlu1 %1458 }
 0x1dd   :  { %1625 = vst.msk [vmem:[%s3602_s4 + $0x64] sm:$0xf] %vm1343_vm2, %v1459_v19 }
 0x1de   :  { %v1521_v39 = vpop.permute.xlu0 %1520 }
 0x1df   :  { %1656 = vst.msk [vmem:[%s3602_s4 + $0xe0] sm:$0xf] %vm1343_vm2, %v1521_v39 }
 0x1e0   :  { %v1523_v5 = vpop.permute.xlu1 %1522 }
 0x1e1   :  { %1657 = vst.msk [vmem:[%s3602_s4 + $0xe4] sm:$0xf] %vm1343_vm2, %v1523_v5 }
 0x1e2   :  { %v1469_v3 = vpop.permute.xlu0 %1468 }
 0x1e3   :  { %1630 = vst.msk [vmem:[%s3602_s4 + $0x78] sm:$0xf] %vm1343_vm2, %v1469_v3 }
 0x1e4   :  { %v1471_v9 = vpop.permute.xlu1 %1470 }
 0x1e5   :  { %1631 = vst.msk [vmem:[%s3602_s4 + $0x7c] sm:$0xf] %vm1343_vm2, %v1471_v9 }
 0x1e6   :  { %v1465_v20 = vpop.permute.xlu0 %1464 }
 0x1e7   :  { %1628 = vst.msk [vmem:[%s3602_s4 + $0x70] sm:$0xf] %vm1343_vm2, %v1465_v20 }
 0x1e8   :  { %v1467_v15 = vpop.permute.xlu1 %1466 }
 0x1e9   :  { %1629 = vst.msk [vmem:[%s3602_s4 + $0x74] sm:$0xf] %vm1343_vm2, %v1467_v15 }
 0x1ea   :  { %v1529_v47 = vpop.permute.xlu0 %1528 }
 0x1eb   :  { %1660 = vst.msk [vmem:[%s3602_s4 + $0xf0] sm:$0xf] %vm1343_vm2, %v1529_v47 }
 0x1ec   :  { %v1531_v10 = vpop.permute.xlu1 %1530 }
 0x1ed   :  { %1661 = vst.msk [vmem:[%s3602_s4 + $0xf4] sm:$0xf] %vm1343_vm2, %v1531_v10 }
 0x1ee   :  { %v1533_v18 = vpop.permute.xlu0 %1532 }
 0x1ef   :  { %1662 = vst.msk [vmem:[%s3602_s4 + $0xf8] sm:$0xf] %vm1343_vm2, %v1533_v18 }
 0x1f0   :  { %v1535_v63 = vpop.permute.xlu1 %1534 }
 0x1f1   :  { %1663 = vst.msk [vmem:[%s3602_s4 + $0xfc] sm:$0xf] %vm1343_vm2, %v1535_v63 }

</bundles_post_ra>
